<compile_context>
chip_gen: v7x
topology: tpu7x:2x2x1
jax: 0.10.0
libtpu: 0.0.40
codegen_flags: <defaults>
</compile_context>

<pallas_src>
import functools

import jax
import jax.numpy as jnp
from jax.experimental import pallas as pl
from jax.experimental.pallas import tpu as pltpu


# ----------------------------- Pallas kernel: one GCN layer -----------------------------

def _gcn_layer_kernel(*refs, tk, apply_bn_relu):
    if apply_bn_relu:
        adj_ref, rhs_ref, w_ref, scale_ref, shift_ref, o_ref, acc_ref = refs
    else:
        adj_ref, rhs_ref, w_ref, o_ref, acc_ref = refs
        scale_ref = shift_ref = None

    k = pl.program_id(1)
    nk = pl.num_programs(1)

    a = adj_ref[...]                                   # (tm, tk) bf16 adjacency tile (streamed)
    r0 = pl.multiple_of(k * tk, tk)
    rk = rhs_ref[pl.ds(r0, tk), :]                     # (tk, cpad) bf16 slice of VMEM-resident operand
    contrib = jnp.dot(a, rk, preferred_element_type=jnp.float32)

    @pl.when(k == 0)
    def _first():                                      # write (no separate zero-init pass)
        acc_ref[...] = contrib

    @pl.when(k > 0)
    def _accum():
        acc_ref[...] += contrib

    @pl.when(k == nk - 1)
    def _epilogue():                                   # hoisted out of the k loop, once per row tile
        g = jnp.dot(acc_ref[...].astype(jnp.bfloat16), w_ref[...],
                    preferred_element_type=jnp.float32)
        if apply_bn_relu:
            g = jnp.maximum(g * scale_ref[...] + shift_ref[...], 0.0)
        o_ref[...] = g.astype(o_ref.dtype)


def _gcn_layer_call(adj_p, rhs_p, w_aug, scale_p, shift_p, *, tm, tk, out_dtype,
                    apply_bn_relu, vmem_limit):
    n_pad, cpad = rhs_p.shape
    ni, nk = n_pad // tm, n_pad // tk

    in_specs = [
        pl.BlockSpec((tm, tk), lambda i, k: (i, k)),         # adjacency: streamed bf16 tiles
        pl.BlockSpec((n_pad, cpad), lambda i, k: (0, 0)),    # rhs (x_aug / h): fetched once, resident
        pl.BlockSpec((cpad, cpad), lambda i, k: (0, 0)),     # weight (+bias row), bf16, resident
    ]
    args = [adj_p, rhs_p, w_aug]
    if apply_bn_relu:
        in_specs += [pl.BlockSpec((1, cpad), lambda i, k: (0, 0)),    # BN scale (f32)
                     pl.BlockSpec((1, cpad), lambda i, k: (0, 0))]    # BN shift (+ones col, f32)
        args += [scale_p, shift_p]

    return pl.pallas_call(
        functools.partial(_gcn_layer_kernel, tk=tk, apply_bn_relu=apply_bn_relu),
        out_shape=jax.ShapeDtypeStruct((n_pad, cpad), out_dtype),
        grid=(ni, nk),
        in_specs=in_specs,
        out_specs=pl.BlockSpec((tm, cpad), lambda i, k: (i, 0)),
        scratch_shapes=[pltpu.VMEM((tm, cpad), jnp.float32)],          # f32 matmul accumulator
        compiler_params=pltpu.CompilerParams(
            # rows independent -> "parallel" (2 TCs on v7x); k is the reduction -> "arbitrary"
            dimension_semantics=("parallel", "arbitrary"),
            vmem_limit_bytes=vmem_limit,
        ),
    )(*args)


# ----------------------------- plain-JAX glue -----------------------------

def _round_up(v, m):
    return (v + m - 1) // m * m


def _pick_tiles(n):
    """Largest (tm, tk) up to (256, 2048) whose zero padding inflates the dense adjacency by
    <10%; tiny graphs fall back to (128, 128) so padding does not dominate."""
    n128 = _round_up(n, 128)
    tk = 128
    for cand in (256, 512, 1024, 2048):
        if _round_up(n, cand) * 10 <= n128 * 11:
            tk = cand
    tm = 256 if tk >= 256 else 128
    n_pad = _round_up(n, tk)          # tm | tk | n_pad
    return tm, tk, n_pad


def _vmem_limit_bytes():
    """Generation-aware scoped-VMEM budget: ~56 MiB on v7x (64 MiB/TC), up to 100 MiB on
    v5e/v6e (128 MiB); conservative fallback if the hardware query is unavailable."""
    try:
        cap = int(pltpu.get_tpu_info().vmem_capacity_bytes)
        return max(32 << 20, min(cap - (8 << 20), 100 << 20))
    except Exception:
        return 48 << 20


def build_normalized_adj(edge_index, num_nodes):
    """remove_self_loops -> add_self_loops -> D^-1/2 A D^-1/2 (degree computed on dst),
    returned as a dense (N, N) float32 matrix. Pure setup glue (scatter), done outside the kernel."""
    src, dst = edge_index[0], edge_index[1]
    keep = (src != dst).astype(jnp.float32)            # remove self loops
    a = jnp.zeros((num_nodes, num_nodes), jnp.float32)
    a = a.at[src, dst].add(keep)                       # duplicate edges sum (sparse_coo coalesce)
    a = a + jnp.eye(num_nodes, dtype=jnp.float32)      # add self loops
    deg = jnp.sum(a, axis=0)                           # degree(dst): per-column edge count
    d_inv_sqrt = jnp.where(deg > 0, 1.0 / jnp.sqrt(deg), 0.0)   # inf -> 0 masking
    return a * d_inv_sqrt[:, None] * d_inv_sqrt[None, :]


def geomix3_forward(x, edge_index, params):
    """GeoMix3.forward (num_layers=2, use_bn=True, eval mode) — two tiled Pallas GCN-layer calls."""
    n, in_c = x.shape
    hid_c = params["w1"].shape[1]
    out_c = params["w2"].shape[1]

    # Lane-dense uniform channel padding (>= +1 for the bias ones-column folding tricks).
    cpad = _round_up(max(in_c + 1, hid_c + 1, out_c), 128)
    tm, tk, n_pad = _pick_tiles(n)
    vmem_limit = _vmem_limit_bytes()

    # Dense normalized adjacency, zero-padded, bf16 for the MXU / HBM streaming.
    adj = build_normalized_adj(edge_index, n)
    adj_p = jnp.zeros((n_pad, n_pad), jnp.bfloat16).at[:n, :n].set(adj.astype(jnp.bfloat16))

    # x augmented with a ones column at index in_c (carries the layer-1 bias through adj@x).
    x_p = jnp.zeros((n_pad, cpad), jnp.bfloat16)
    x_p = x_p.at[:n, :in_c].set(x.astype(jnp.bfloat16))
    x_p = x_p.at[:n, in_c].set(jnp.bfloat16(1.0))

    # W1 augmented with the bias row (bf16 for the MXU epilogue dot):
    #   (adj @ [x, 1]) @ [[W1], [b1]] == adj @ (x W1 + b1).
    w1_aug = (jnp.zeros((cpad, cpad), jnp.float32)
              .at[:in_c, :hid_c].set(params["w1"])
              .at[in_c, :hid_c].set(params["b1"].reshape(-1))).astype(jnp.bfloat16)

    # BN (eval mode) folded to one f32 FMA; padded channel hid_c gets scale=0, shift=1 so h
    # carries a ones column (relu(0*scale + 1) == 1) that picks up the layer-2 bias row of W2_aug.
    scale = params["bn_gamma"].reshape(-1) * jax.lax.rsqrt(params["bn_var"].reshape(-1) + 1e-5)
    shift = params["bn_beta"].reshape(-1) - params["bn_mean"].reshape(-1) * scale
    scale_p = jnp.zeros((1, cpad), jnp.float32).at[0, :hid_c].set(scale)
    shift_p = (jnp.zeros((1, cpad), jnp.float32)
               .at[0, :hid_c].set(shift)
               .at[0, hid_c].set(1.0))

    w2_aug = (jnp.zeros((cpad, cpad), jnp.float32)
              .at[:hid_c, :out_c].set(params["w2"])
              .at[hid_c, :out_c].set(params["b2"].reshape(-1))).astype(jnp.bfloat16)

    # Layer 1: h = relu(BN(adj @ (x W1 + b1)))   (dropout is identity in eval mode) -> bf16 h.
    h = _gcn_layer_call(adj_p, x_p, w1_aug, scale_p, shift_p,
                        tm=tm, tk=tk, out_dtype=jnp.bfloat16,
                        apply_bn_relu=True, vmem_limit=vmem_limit)

    # Layer 2: out = adj @ (h W2 + b2)   (bias via h's ones column + W2_aug bias row).
    out_p = _gcn_layer_call(adj_p, h, w2_aug, None, None,
                            tm=tm, tk=tk, out_dtype=jnp.float32,
                            apply_bn_relu=False, vmem_limit=vmem_limit)

    return out_p[:n, :out_c]


# ----------------------------- demo / self-test -----------------------------

def init_params(key, in_channels, hidden_channels, out_channels):
    ks = jax.random.split(key, 8)

    def glorot(k, fan_in, fan_out):
        limit = jnp.sqrt(6.0 / (fan_in + fan_out))
        return jax.random.uniform(k, (fan_in, fan_out), jnp.float32, -limit, limit)

    return {
        # GCNLayer 0: Linear(in -> hidden), stored as (in, hidden) so the kernel does x @ W
        "w1": glorot(ks[0], in_channels, hidden_channels),
        "b1": 0.1 * jax.random.normal(ks[1], (1, hidden_channels), jnp.float32),
        # BatchNorm1d(hidden) eval-mode parameters / running stats
        "bn_gamma": 1.0 + 0.1 * jax.random.normal(ks[2], (1, hidden_channels), jnp.float32),
        "bn_beta": 0.1 * jax.random.normal(ks[3], (1, hidden_channels), jnp.float32),
        "bn_mean": 0.1 * jax.random.normal(ks[4], (1, hidden_channels), jnp.float32),
        "bn_var": jnp.abs(1.0 + 0.1 * jax.random.normal(ks[5], (1, hidden_channels), jnp.float32)),
        # GCNLayer 1: Linear(hidden -> out)
        "w2": glorot(ks[6], hidden_channels, out_channels),
        "b2": 0.1 * jax.random.normal(ks[7], (1, out_channels), jnp.float32),
    }


if __name__ == "__main__":
    key = jax.random.PRNGKey(0)
    k_x, k_e1, k_e2, k_p = jax.random.split(key, 4)

    N = 300            # nodes (not a multiple of 128 -> exercises padding path)
    E = 1200           # edges
    IN_C, HID_C, OUT_C = 32, 64, 16

    x = jax.random.normal(k_x, (N, IN_C), jnp.float32)
    edge_index = jnp.stack([
        jax.random.randint(k_e1, (E,), 0, N, dtype=jnp.int32),
        jax.random.randint(k_e2, (E,), 0, N, dtype=jnp.int32),
    ])
    params = init_params(k_p, IN_C, HID_C, OUT_C)

    out = jax.jit(geomix3_forward)(x, edge_index, params)
    out = jax.block_until_ready(out)

    # pure-JAX f32 reference of the same math (kernel uses bf16 adjacency/activations/weights with
    # f32 accumulation, so the comparison tolerance is relaxed accordingly)
    adj = build_normalized_adj(edge_index, N)
    h_ref = adj @ (x @ params["w1"] + params["b1"])
    h_ref = (h_ref - params["bn_mean"]) * jax.lax.rsqrt(params["bn_var"] + 1e-5) \
            * params["bn_gamma"] + params["bn_beta"]
    h_ref = jnp.maximum(h_ref, 0.0)
    out_ref = adj @ (h_ref @ params["w2"] + params["b2"])

    assert out.shape == (N, OUT_C)
    assert jnp.allclose(out, out_ref, atol=5e-2, rtol=5e-2)

    print("KERNEL_OK")
</pallas_src>

<mosaic_0001>
module attributes {stable_mosaic.version = 11 : i64} {
  func.func private @main(%arg0: i32) attributes {dimension_semantics = [#tpu.dimension_semantics<core_parallel>], iteration_bounds = array<i64: 2>, tpu.core_type = #tpu.core_type<sc_scalar_subcore>, window_params = []} {
    return
  }
}

module attributes {stable_mosaic.version = 11 : i64} {
  func.func private @main(%arg0: i32) attributes {dimension_semantics = [#tpu.dimension_semantics<core_parallel>], iteration_bounds = array<i64: 2>, tpu.core_type = #tpu.core_type<sc_scalar_subcore>, window_params = []} {
    return
  }
}

module attributes {stable_mosaic.version = 11 : i64} {
  func.func @_gcn_layer_kernel(%arg0: i32, %arg1: i32, %arg2: memref<128x128xbf16, #tpu.memory_space<vmem>>, %arg3: memref<384x128xbf16, #tpu.memory_space<vmem>>, %arg4: memref<128x128xbf16, #tpu.memory_space<vmem>>, %arg5: memref<1x128xf32, #tpu.memory_space<vmem>>, %arg6: memref<1x128xf32, #tpu.memory_space<vmem>>, %arg7: memref<128x128xbf16, #tpu.memory_space<vmem>>, %arg8: memref<128x128xf32, #tpu.memory_space<vmem>>) attributes {dimension_semantics = [#tpu.dimension_semantics<parallel>, #tpu.dimension_semantics<arbitrary>], iteration_bounds = array<i64: 3, 3>, scalar_prefetch = 0 : i64, scratch_operands = 1 : i64, tpu.core_type = #tpu.core_type<tc>, window_params = [{transform_indices = @transform_0, window_bounds = array<i64: 128, 128>}, {pipeline_mode = #tpu.pipeline_mode<synchronous>, transform_indices = @transform_1, window_bounds = array<i64: 384, 128>}, {pipeline_mode = #tpu.pipeline_mode<synchronous>, transform_indices = @transform_2, window_bounds = array<i64: 128, 128>}, {pipeline_mode = #tpu.pipeline_mode<synchronous>, transform_indices = @transform_3, window_bounds = array<i64: 1, 128>}, {pipeline_mode = #tpu.pipeline_mode<synchronous>, transform_indices = @transform_4, window_bounds = array<i64: 1, 128>}, {transform_indices = @transform_5, window_bounds = array<i64: 128, 128>}]} {
    %c0 = arith.constant 0 : index
    %c0_0 = arith.constant 0 : index
    %0 = vector.load %arg2[%c0, %c0_0] : memref<128x128xbf16, #tpu.memory_space<vmem>>, vector<128x128xbf16>
    %c128_i32 = arith.constant 128 : i32
    %1 = arith.muli %arg1, %c128_i32 : i32
    %2 = tpu.assume_multiple %1, 128 : i32
    %3 = arith.index_cast %2 : i32 to index
    %c0_1 = arith.constant 0 : index
    %4 = vector.load %arg3[%3, %c0_1] : memref<384x128xbf16, #tpu.memory_space<vmem>>, vector<128x128xbf16>
    %cst = arith.constant dense<0.000000e+00> : vector<128x128xf32>
    %5 = tpu.matmul %0, %4, %cst {dimension_numbers = #tpu.dot_dimension_numbers<[1], [0], [0], [1], [0, 0, 1, 1], [], []>} : vector<128x128xbf16>, vector<128x128xbf16>, vector<128x128xf32> -> vector<128x128xf32>
    %c0_i32 = arith.constant 0 : i32
    %6 = arith.cmpi eq, %arg1, %c0_i32 : i32
    %7 = arith.extui %6 : i1 to i32
    %c0_i32_2 = arith.constant 0 : i32
    %8 = arith.cmpi ne, %7, %c0_i32_2 : i32
    scf.if %8 {
      %c0_6 = arith.constant 0 : index
      %c0_7 = arith.constant 0 : index
      %15 = vector.load %arg8[%c0_6, %c0_7] : memref<128x128xf32, #tpu.memory_space<vmem>>, vector<128x128xf32>
      tpu.vector_store %arg8[%c0_6, %c0_7], %5 {strides = array<i32>} : memref<128x128xf32, #tpu.memory_space<vmem>>, vector<128x128xf32>,
    } else {
    }
    %c0_i32_3 = arith.constant 0 : i32
    %9 = arith.cmpi sgt, %arg1, %c0_i32_3 : i32
    %10 = arith.extui %9 : i1 to i32
    %c0_i32_4 = arith.constant 0 : i32
    %11 = arith.cmpi ne, %10, %c0_i32_4 : i32
    scf.if %11 {
      %c0_6 = arith.constant 0 : index
      %c0_7 = arith.constant 0 : index
      %15 = vector.load %arg8[%c0_6, %c0_7] : memref<128x128xf32, #tpu.memory_space<vmem>>, vector<128x128xf32>
      %16 = arith.addf %15, %5 : vector<128x128xf32>
      %c0_8 = arith.constant 0 : index
      %c0_9 = arith.constant 0 : index
      %17 = vector.load %arg8[%c0_8, %c0_9] : memref<128x128xf32, #tpu.memory_space<vmem>>, vector<128x128xf32>
      tpu.vector_store %arg8[%c0_8, %c0_9], %16 {strides = array<i32>} : memref<128x128xf32, #tpu.memory_space<vmem>>, vector<128x128xf32>,
    } else {
    }
    %c2_i32 = arith.constant 2 : i32
    %12 = arith.cmpi eq, %arg1, %c2_i32 : i32
    %13 = arith.extui %12 : i1 to i32
    %c0_i32_5 = arith.constant 0 : i32
    %14 = arith.cmpi ne, %13, %c0_i32_5 : i32
    scf.if %14 {
      %c0_6 = arith.constant 0 : index
      %c0_7 = arith.constant 0 : index
      %15 = vector.load %arg8[%c0_6, %c0_7] : memref<128x128xf32, #tpu.memory_space<vmem>>, vector<128x128xf32>
      %16 = arith.truncf %15 : vector<128x128xf32> to vector<128x128xbf16>
      %c0_8 = arith.constant 0 : index
      %c0_9 = arith.constant 0 : index
      %17 = vector.load %arg4[%c0_8, %c0_9] : memref<128x128xbf16, #tpu.memory_space<vmem>>, vector<128x128xbf16>
      %cst_10 = arith.constant dense<0.000000e+00> : vector<128x128xf32>
      %18 = tpu.matmul %16, %17, %cst_10 {dimension_numbers = #tpu.dot_dimension_numbers<[1], [0], [0], [1], [0, 0, 1, 1], [], []>} : vector<128x128xbf16>, vector<128x128xbf16>, vector<128x128xf32> -> vector<128x128xf32>
      %c0_11 = arith.constant 0 : index
      %c0_12 = arith.constant 0 : index
      %19 = vector.load %arg5[%c0_11, %c0_12] : memref<1x128xf32, #tpu.memory_space<vmem>>, vector<1x128xf32>
      %20 = vector.broadcast %19 : vector<1x128xf32> to vector<128x128xf32>
      %21 = arith.mulf %18, %20 : vector<128x128xf32>
      %c0_13 = arith.constant 0 : index
      %c0_14 = arith.constant 0 : index
      %22 = vector.load %arg6[%c0_13, %c0_14] : memref<1x128xf32, #tpu.memory_space<vmem>>, vector<1x128xf32>
      %23 = vector.broadcast %22 : vector<1x128xf32> to vector<128x128xf32>
      %24 = arith.addf %21, %23 : vector<128x128xf32>
      %cst_15 = arith.constant 0.000000e+00 : f32
      %25 = vector.broadcast %cst_15 : f32 to vector<128x128xf32>
      %26 = arith.maximumf %24, %25 : vector<128x128xf32>
      %27 = arith.truncf %26 : vector<128x128xf32> to vector<128x128xbf16>
      %c0_16 = arith.constant 0 : index
      %c0_17 = arith.constant 0 : index
      %28 = vector.load %arg7[%c0_16, %c0_17] : memref<128x128xbf16, #tpu.memory_space<vmem>>, vector<128x128xbf16>
      tpu.vector_store %arg7[%c0_16, %c0_17], %27 {strides = array<i32>} : memref<128x128xbf16, #tpu.memory_space<vmem>>, vector<128x128xbf16>,
    } else {
    }
    return
  }
  func.func @transform_0(%arg0: i32, %arg1: i32) -> (i32, i32) {
    %c0_i32 = arith.constant 0 : i32
    return %arg0, %arg1 : i32, i32
  }
  func.func @transform_1(%arg0: i32, %arg1: i32) -> (i32, i32) {
    %c0_i32 = arith.constant 0 : i32
    %c0_i32_0 = arith.constant 0 : i32
    %c0_i32_1 = arith.constant 0 : i32
    return %c0_i32, %c0_i32_0 : i32, i32
  }
  func.func @transform_2(%arg0: i32, %arg1: i32) -> (i32, i32) {
    %c0_i32 = arith.constant 0 : i32
    %c0_i32_0 = arith.constant 0 : i32
    %c0_i32_1 = arith.constant 0 : i32
    return %c0_i32, %c0_i32_0 : i32, i32
  }
  func.func @transform_3(%arg0: i32, %arg1: i32) -> (i32, i32) {
    %c0_i32 = arith.constant 0 : i32
    %c0_i32_0 = arith.constant 0 : i32
    %c0_i32_1 = arith.constant 0 : i32
    return %c0_i32, %c0_i32_0 : i32, i32
  }
  func.func @transform_4(%arg0: i32, %arg1: i32) -> (i32, i32) {
    %c0_i32 = arith.constant 0 : i32
    %c0_i32_0 = arith.constant 0 : i32
    %c0_i32_1 = arith.constant 0 : i32
    return %c0_i32, %c0_i32_0 : i32, i32
  }
  func.func @transform_5(%arg0: i32, %arg1: i32) -> (i32, i32) {
    %c0_i32 = arith.constant 0 : i32
    %c0_i32_0 = arith.constant 0 : i32
    return %arg0, %c0_i32 : i32, i32
  }
}

module attributes {stable_mosaic.version = 11 : i64} {
  func.func @_gcn_layer_kernel(%arg0: i32, %arg1: i32, %arg2: memref<128x128xbf16, #tpu.memory_space<vmem>>, %arg3: memref<384x128xbf16, #tpu.memory_space<vmem>>, %arg4: memref<128x128xbf16, #tpu.memory_space<vmem>>, %arg5: memref<128x128xf32, #tpu.memory_space<vmem>>, %arg6: memref<128x128xf32, #tpu.memory_space<vmem>>) attributes {dimension_semantics = [#tpu.dimension_semantics<parallel>, #tpu.dimension_semantics<arbitrary>], iteration_bounds = array<i64: 3, 3>, scalar_prefetch = 0 : i64, scratch_operands = 1 : i64, tpu.core_type = #tpu.core_type<tc>, window_params = [{transform_indices = @transform_0, window_bounds = array<i64: 128, 128>}, {pipeline_mode = #tpu.pipeline_mode<synchronous>, transform_indices = @transform_1, window_bounds = array<i64: 384, 128>}, {pipeline_mode = #tpu.pipeline_mode<synchronous>, transform_indices = @transform_2, window_bounds = array<i64: 128, 128>}, {transform_indices = @transform_3, window_bounds = array<i64: 128, 128>}]} {
    %c0 = arith.constant 0 : index
    %c0_0 = arith.constant 0 : index
    %0 = vector.load %arg2[%c0, %c0_0] : memref<128x128xbf16, #tpu.memory_space<vmem>>, vector<128x128xbf16>
    %c128_i32 = arith.constant 128 : i32
    %1 = arith.muli %arg1, %c128_i32 : i32
    %2 = tpu.assume_multiple %1, 128 : i32
    %3 = arith.index_cast %2 : i32 to index
    %c0_1 = arith.constant 0 : index
    %4 = vector.load %arg3[%3, %c0_1] : memref<384x128xbf16, #tpu.memory_space<vmem>>, vector<128x128xbf16>
    %cst = arith.constant dense<0.000000e+00> : vector<128x128xf32>
    %5 = tpu.matmul %0, %4, %cst {dimension_numbers = #tpu.dot_dimension_numbers<[1], [0], [0], [1], [0, 0, 1, 1], [], []>} : vector<128x128xbf16>, vector<128x128xbf16>, vector<128x128xf32> -> vector<128x128xf32>
    %c0_i32 = arith.constant 0 : i32
    %6 = arith.cmpi eq, %arg1, %c0_i32 : i32
    %7 = arith.extui %6 : i1 to i32
    %c0_i32_2 = arith.constant 0 : i32
    %8 = arith.cmpi ne, %7, %c0_i32_2 : i32
    scf.if %8 {
      %c0_6 = arith.constant 0 : index
      %c0_7 = arith.constant 0 : index
      %15 = vector.load %arg6[%c0_6, %c0_7] : memref<128x128xf32, #tpu.memory_space<vmem>>, vector<128x128xf32>
      tpu.vector_store %arg6[%c0_6, %c0_7], %5 {strides = array<i32>} : memref<128x128xf32, #tpu.memory_space<vmem>>, vector<128x128xf32>,
    } else {
    }
    %c0_i32_3 = arith.constant 0 : i32
    %9 = arith.cmpi sgt, %arg1, %c0_i32_3 : i32
    %10 = arith.extui %9 : i1 to i32
    %c0_i32_4 = arith.constant 0 : i32
    %11 = arith.cmpi ne, %10, %c0_i32_4 : i32
    scf.if %11 {
      %c0_6 = arith.constant 0 : index
      %c0_7 = arith.constant 0 : index
      %15 = vector.load %arg6[%c0_6, %c0_7] : memref<128x128xf32, #tpu.memory_space<vmem>>, vector<128x128xf32>
      %16 = arith.addf %15, %5 : vector<128x128xf32>
      %c0_8 = arith.constant 0 : index
      %c0_9 = arith.constant 0 : index
      %17 = vector.load %arg6[%c0_8, %c0_9] : memref<128x128xf32, #tpu.memory_space<vmem>>, vector<128x128xf32>
      tpu.vector_store %arg6[%c0_8, %c0_9], %16 {strides = array<i32>} : memref<128x128xf32, #tpu.memory_space<vmem>>, vector<128x128xf32>,
    } else {
    }
    %c2_i32 = arith.constant 2 : i32
    %12 = arith.cmpi eq, %arg1, %c2_i32 : i32
    %13 = arith.extui %12 : i1 to i32
    %c0_i32_5 = arith.constant 0 : i32
    %14 = arith.cmpi ne, %13, %c0_i32_5 : i32
    scf.if %14 {
      %c0_6 = arith.constant 0 : index
      %c0_7 = arith.constant 0 : index
      %15 = vector.load %arg6[%c0_6, %c0_7] : memref<128x128xf32, #tpu.memory_space<vmem>>, vector<128x128xf32>
      %16 = arith.truncf %15 : vector<128x128xf32> to vector<128x128xbf16>
      %c0_8 = arith.constant 0 : index
      %c0_9 = arith.constant 0 : index
      %17 = vector.load %arg4[%c0_8, %c0_9] : memref<128x128xbf16, #tpu.memory_space<vmem>>, vector<128x128xbf16>
      %cst_10 = arith.constant dense<0.000000e+00> : vector<128x128xf32>
      %18 = tpu.matmul %16, %17, %cst_10 {dimension_numbers = #tpu.dot_dimension_numbers<[1], [0], [0], [1], [0, 0, 1, 1], [], []>} : vector<128x128xbf16>, vector<128x128xbf16>, vector<128x128xf32> -> vector<128x128xf32>
      %c0_11 = arith.constant 0 : index
      %c0_12 = arith.constant 0 : index
      %19 = vector.load %arg5[%c0_11, %c0_12] : memref<128x128xf32, #tpu.memory_space<vmem>>, vector<128x128xf32>
      tpu.vector_store %arg5[%c0_11, %c0_12], %18 {strides = array<i32>} : memref<128x128xf32, #tpu.memory_space<vmem>>, vector<128x128xf32>,
    } else {
    }
    return
  }
  func.func @transform_0(%arg0: i32, %arg1: i32) -> (i32, i32) {
    %c0_i32 = arith.constant 0 : i32
    return %arg0, %arg1 : i32, i32
  }
  func.func @transform_1(%arg0: i32, %arg1: i32) -> (i32, i32) {
    %c0_i32 = arith.constant 0 : i32
    %c0_i32_0 = arith.constant 0 : i32
    %c0_i32_1 = arith.constant 0 : i32
    return %c0_i32, %c0_i32_0 : i32, i32
  }
  func.func @transform_2(%arg0: i32, %arg1: i32) -> (i32, i32) {
    %c0_i32 = arith.constant 0 : i32
    %c0_i32_0 = arith.constant 0 : i32
    %c0_i32_1 = arith.constant 0 : i32
    return %c0_i32, %c0_i32_0 : i32, i32
  }
  func.func @transform_3(%arg0: i32, %arg1: i32) -> (i32, i32) {
    %c0_i32 = arith.constant 0 : i32
    %c0_i32_0 = arith.constant 0 : i32
    return %arg0, %c0_i32 : i32, i32
  }
}

</mosaic_0001>

<bundles_post_ra>
// kernel: geomix3_forward.3
= control target key start
LH: loop header
LB: loop body
LE: loop exit
PB: predicated region body
PF: predicated region fallthrough
CT: control target
= control target key end

     0   :  { %s1205_s12 = smov 0   ;;  %s1207_s13 = smov 0   ;;  %s1392_s0 = inlined_call_operand.vmem [shape: bf16[384,384], index: 0, kind: input, shape index: {}]   ;;  %s1393_s1 = inlined_call_operand.vmem [shape: bf16[384,128], index: 1, kind: input, shape index: {}]   ;;  %s1394_s2 = inlined_call_operand.vmem [shape: bf16[128,128], index: 2, kind: input, shape index: {}]   ;;  %s1395_s3 = inlined_call_operand.vmem [shape: f32[384,128], index: 3, kind: output, shape index: {}]  }
   0x1   :  { %s1209_s14 = smov 0   ;;  %s1211_s15 = smov 0  }
   0x2   :  { %s1213_s16 = smov 0   ;;  %s1215_s17 = smov 0  }
   0x3   :  { %s1217_s18 = smov 0  }
   0x4 LB: > { %s22_s19 = sadd.s32 1, %s1175_s16  ;;  %s25_s20 = sadd.s32 1, %s1179_s17  ;;  %s1183_s18 = sphi %s1217_s18, %s13_s18   ;;  %s1179_s17 = sphi %s1215_s17, %s1401_s17   ;;  %s1175_s16 = sphi %s1213_s16, %s1400_s16   ;;  %s1171_s15 = sphi %s1211_s15, %s1399_s15   ;;  %s1167_s14 = sphi %s1209_s14, %s1398_s14   ;;  %s1163_s13 = sphi %s1207_s13, %s1397_s13   ;;  %s1159_s12 = sphi %s1205_s12, %s1396_s12  }
   0x5   : > { %p23_p0 = scmp.ge.s32.totalorder %s22_s19, 3  ;;  %p41_p1 = scmp.ne.s32.totalorder %s1163_s13, %s1159_s12 }
   0x6   : > { %p42_p2 = scmp.eq.s32.totalorder %s1183_s18, 0  ;;  %s34_s24 = sadd.s32 1, %s1163_s13 }
   0x7   : > { %s1403_s19 = smov (%p23_p0, %s22_s19), 0  ;;  %s1405_s20 = smov (!%p23_p0, %s25_s20), %s1179_s17 }
   0x8   : > { %p43_p3 = por %p42_p2, %p41_p1  ;;  %p27_p4 = scmp.ge.s32.totalorder %s1405_s20, 3 }
   0x9   : > { %s30_s21 = ssub.s32 %s1175_s16, %s1403_s19  ;;  %p880_p6 = scmp.ge.s32.totalorder %s1183_s18, 9 }
   0xa   : > { %s1407_s20 = smov (%p27_p4, %s1405_s20), 0 }
   0xb   : > { %s29_s22 = ssub.s32 %s1179_s17, %s1407_s20  ;;  %141 = sbr.rel (%p880_p6) target bundleno = 35 (0x23), region = 24 }
   0xc   : > { %s31_s23 = sor.u32 %s30_s21, %s29_s22 }
   0xd   : > { %p32_p5 = scmp.eq.s32.totalorder %s31_s23, 0 }
   0xf   : > { %s1256_s25 = scalar_select %p32_p5, %s1163_s13, %s34_s24  }
  0x12   : > { %144 = sbr.rel (!%p43_p3) target bundleno = 35 (0x23), region = 28  ;;  %s146_s26 = sand.u32 (%p43_p3), 1, %s1163_s13  }
  0x13   : > { %s1048_s27 = smul.u32 (%p43_p3), 48, %s1179_s17  ;;  %s881_s28 = sshll.u32 (%p43_p3), %s146_s26, 6 }
  0x14   : > { %s148_s7 = scalar_lea.vmem (%p43_p3), [#allocation3], %s881_s28 }
  0x15   : > { %s151_s29 = sadd.s32 (%p43_p3), %s1175_s16, %s1048_s27 }
  0x16   : > { %s884_s30 = sshll.u32 (%p43_p3), %s151_s29, 2 }
  0x17   : > { %s1265_s6 = scalar_lea.vmem (%p43_p3), %s1392_s0, %s884_s30 }
  0x18   : > { %v169_v0 = vld [vmem:[%s1265_s6] sm:$0xf] (%p43_p3)  ;;  %v171_v1 = vld [vmem:[%s1265_s6 + $0xc] sm:$0xf] (%p43_p3)  ;;  %v173_v2 = vld [vmem:[%s1265_s6 + $0x18] sm:$0xf] (%p43_p3) }
  0x19   : > { %170 = vst [vmem:[%s148_s7] sm:$0xf] %v169_v0  ;;  %172 = vst [vmem:[%s148_s7 + $0x4] sm:$0xf] %v171_v1  ;;  %v175_v3 = vld [vmem:[%s1265_s6 + $0x24] sm:$0xf] }
  0x1a   : > { %174 = vst [vmem:[%s148_s7 + $0x8] sm:$0xf] %v173_v2  ;;  %v177_v4 = vld [vmem:[%s1265_s6 + $0x30] sm:$0xf]  ;;  %v179_v5 = vld [vmem:[%s1265_s6 + $0x3c] sm:$0xf] }
  0x1b   : > { %176 = vst [vmem:[%s148_s7 + $0xc] sm:$0xf] %v175_v3  ;;  %178 = vst [vmem:[%s148_s7 + $0x10] sm:$0xf] %v177_v4  ;;  %v181_v6 = vld [vmem:[%s1265_s6 + $0x48] sm:$0xf] }
  0x1c   : > { %180 = vst [vmem:[%s148_s7 + $0x14] sm:$0xf] %v179_v5  ;;  %v183_v7 = vld [vmem:[%s1265_s6 + $0x54] sm:$0xf]  ;;  %v185_v8 = vld [vmem:[%s1265_s6 + $0x60] sm:$0xf] }
  0x1d   : > { %182 = vst [vmem:[%s148_s7 + $0x18] sm:$0xf] %v181_v6  ;;  %184 = vst [vmem:[%s148_s7 + $0x1c] sm:$0xf] %v183_v7  ;;  %v187_v9 = vld [vmem:[%s1265_s6 + $0x6c] sm:$0xf] }
  0x1e   : > { %186 = vst [vmem:[%s148_s7 + $0x20] sm:$0xf] %v185_v8  ;;  %v189_v10 = vld [vmem:[%s1265_s6 + $0x78] sm:$0xf]  ;;  %v191_v11 = vld [vmem:[%s1265_s6 + $0x84] sm:$0xf] }
  0x1f   : > { %188 = vst [vmem:[%s148_s7 + $0x24] sm:$0xf] %v187_v9  ;;  %190 = vst [vmem:[%s148_s7 + $0x28] sm:$0xf] %v189_v10  ;;  %v193_v12 = vld [vmem:[%s1265_s6 + $0x90] sm:$0xf] }
  0x20   : > { %192 = vst [vmem:[%s148_s7 + $0x2c] sm:$0xf] %v191_v11  ;;  %v195_v13 = vld [vmem:[%s1265_s6 + $0x9c] sm:$0xf]  ;;  %v197_v14 = vld [vmem:[%s1265_s6 + $0xa8] sm:$0xf] }
  0x21   : > { %194 = vst [vmem:[%s148_s7 + $0x30] sm:$0xf] %v193_v12  ;;  %196 = vst [vmem:[%s148_s7 + $0x34] sm:$0xf] %v195_v13  ;;  %v199_v15 = vld [vmem:[%s1265_s6 + $0xb4] sm:$0xf] }
  0x22   : > { %198 = vst [vmem:[%s148_s7 + $0x38] sm:$0xf] %v197_v14  ;;  %200 = vst [vmem:[%s148_s7 + $0x3c] sm:$0xf] %v199_v15 }
  0x23 PF: > { %p885_p7 = scmp.ge.s32.totalorder %s1183_s18, 1  ;;  %p254_p8 = scmp.lt.s32.totalorder %s1183_s18, 10 }
  0x25   : > { %p255_p9 = pnand %p885_p7, %p254_p8 }
  0x26   : > { %s887_s8 = sshll.u32 (!%p255_p9), %s1171_s15, 4  ;;  %s889_s9 = sshll.u32 (!%p255_p9), %s1167_s14, 7 }
  0x27   : > { %258 = sbr.rel (%p255_p9) target bundleno = 571 (0x23b), region = 69  ;;  %p286_p10 = scmp.lt.s32.totalorder (!%p255_p9), %s887_s8, 47 }
  0x28   : > { %s309_s10 = sshra.s32 (!%p255_p9), %s889_s9, 3  ;;  %s261_s24 = sand.u32 (!%p255_p9), 1, %s1159_s12  }
  0x29   : > { %s890_s11 = sshll.u32 (!%p255_p9), %s309_s10, 2  ;;  %s886_s29 = sshll.u32 (!%p255_p9), %s261_s24, 6 }
  0x2a   : > { %s1290_s23 = scalar_lea.vmem (!%p255_p9), %s1393_s1, %s890_s11  ;;  %s1302_s12 = scalar_lea.vmem (!%p255_p9), [#allocation3], %s886_s29 }
  0x2b   : > { %v1105_v16 = vld [vmem:[%s1290_s23] sm:$0xff] (!%p255_p9)   ;;  %v1106_v17 = vld [vmem:[%s1290_s23 + $0x8] sm:$0xff] (!%p255_p9)   ;;  %v1107_v18 = vld [vmem:[%s1290_s23 + $0x10] sm:$0xff] (!%p255_p9)   ;;  %p907_p11 = scmp.ne.s32.totalorder (!%p255_p9), %s1167_s14, 0 }
  0x2c   : > { %952 = vmatprep.subr.bf16.mxu0 (!%p255_p9), %v1105_v16  ;;  %1016 = vmatprep.subr.bf16.mxu1 (!%p255_p9), %v1105_v16  ;;  %v1108_v19 = vld [vmem:[%s1290_s23 + $0x18] sm:$0xff] (!%p255_p9)   ;;  %v1113_v20 = vld [vmem:[%s1302_s12] sm:$0xff] (!%p255_p9)   ;;  %v1110_v23 = vld [vmem:[%s1290_s23 + $0x28] sm:$0xff] (!%p255_p9)  }
  0x2d   : > { %953 = vmatpush3.bf16.msra.mxu0 (!%p255_p9), %v1105_v16  ;;  %1024 = vmatpush3.bf16.msra.mxu1 (!%p255_p9), %v1105_v16  ;;  %v1114_v21 = vld [vmem:[%s1302_s12 + $0x20] sm:$0xff] (!%p255_p9)   ;;  %v1111_v24 = vld [vmem:[%s1290_s23 + $0x30] sm:$0xff] (!%p255_p9)   ;;  %v1112_v25 = vld [vmem:[%s1290_s23 + $0x38] sm:$0xff] (!%p255_p9)  }
  0x2e   : > { %s1409_s8 = smov (!%p286_p10, %s887_s8), 47  ;;  %954 = vmatprep.subr.bf16.mxu0 %v1106_v17  ;;  %1017 = vmatprep.subr.bf16.mxu1 %v1106_v17  ;;  %v1109_v22 = vld [vmem:[%s1290_s23 + $0x20] sm:$0xff]   ;;  %v1115_v26 = vld [vmem:[%s1302_s12 + $0x8] sm:$0xff]   ;;  %v1117_v28 = vld [vmem:[%s1302_s12 + $0x10] sm:$0xff]  }
  0x2f   : > { %s888_s26 = sshll.u32 %s1409_s8, 3  ;;  %968 = vmatprep.mubr.bf16.mxu0 %v1113_v20  ;;  %976 = vmatprep.mubr.bf16.mxu1 %v1114_v21  ;;  %v1116_v27 = vld [vmem:[%s1302_s12 + $0x28] sm:$0xff]   ;;  %v1118_v29 = vld [vmem:[%s1302_s12 + $0x30] sm:$0xff]   ;;  %v1119_v30 = vld [vmem:[%s1302_s12 + $0x18] sm:$0xff]  }
  0x30   : > { %s1297_s15 = scalar_lea.vmem %s1395_s3, %s888_s26  ;;  %v1120_v31 = vld [vmem:[%s1302_s12 + $0x38] sm:$0xff]  }
  0x31   : > { %955 = vmatpush3.bf16.msra.mxu0 %v1106_v17  ;;  %1025 = vmatpush3.bf16.msra.mxu1 %v1106_v17 }
  0x32   : > { %956 = vmatprep.subr.bf16.mxu0 %v1107_v18  ;;  %1018 = vmatprep.subr.bf16.mxu1 %v1107_v18 }
  0x35   : > { %957 = vmatpush3.bf16.msra.mxu0 %v1107_v18  ;;  %1026 = vmatpush3.bf16.msra.mxu1 %v1107_v18 }
  0x36   : > { %958 = vmatprep.subr.bf16.mxu0 %v1108_v19  ;;  %1019 = vmatprep.subr.bf16.mxu1 %v1108_v19 }
  0x39   : > { %959 = vmatpush3.bf16.msra.mxu0 %v1108_v19  ;;  %1027 = vmatpush3.bf16.msra.mxu1 %v1108_v19 }
  0x3a   : > { %960 = vmatprep.subr.bf16.mxu0 %v1109_v22  ;;  %1020 = vmatprep.subr.bf16.mxu1 %v1109_v22 }
  0x3d   : > { %961 = vmatpush3.bf16.msra.mxu0 %v1109_v22  ;;  %1028 = vmatpush3.bf16.msra.mxu1 %v1109_v22 }
  0x3e   : > { %962 = vmatprep.subr.bf16.mxu0 %v1110_v23  ;;  %1021 = vmatprep.subr.bf16.mxu1 %v1110_v23 }
  0x41   : > { %963 = vmatpush3.bf16.msra.mxu0 %v1110_v23  ;;  %1029 = vmatpush3.bf16.msra.mxu1 %v1110_v23 }
  0x42   : > { %964 = vmatprep.subr.bf16.mxu0 %v1111_v24  ;;  %1022 = vmatprep.subr.bf16.mxu1 %v1111_v24 }
  0x45   : > { %965 = vmatpush3.bf16.msra.mxu0 %v1111_v24  ;;  %1030 = vmatpush3.bf16.msra.mxu1 %v1111_v24 }
  0x46   : > { %966 = vmatprep.subr.bf16.mxu0 %v1112_v25  ;;  %1023 = vmatprep.subr.bf16.mxu1 %v1112_v25 }
  0x49   : > { %967 = vmatpush3.bf16.msra.mxu0 %v1112_v25  ;;  %1031 = vmatpush3.bf16.msra.mxu1 %v1112_v25 }
  0x4c   : > { %969 = vmatmul.mubr.bf16.vlgmr.msra.gmra.mrb[0].mxu0 %v1115_v26  ;;  %977 = vmatmul.mubr.bf16.vlgmr.msra.gmra.mrb[0].mxu1 %v1116_v27 }
  0x4d   : > { %972 = vmatprep.mubr.bf16.mxu0 %v1117_v28  ;;  %980 = vmatprep.mubr.bf16.mxu1 %v1118_v29 }
  0x54   : > { %973 = vmatmul.mubr.bf16.gmra.mrb[4].mxu0 %v1119_v30  ;;  %981 = vmatmul.mubr.bf16.gmra.mrb[4].mxu1 %v1120_v31 }
 0x11f   : > { %v970_v32 = vpop.f32.mrb[0].mxu0  ;;  %v1316_v33 = vpop.f32.mrb[0].mxu1 }
 0x120   : > { %v459_v34 = vpop.f32.mrb[1].mxu0  ;;  %v491_v35 = vpop.f32.mrb[1].mxu1  ;;  %528 = vst [vmem:[#allocation2 + $0x10] sm:$0xff] (!%p907_p11), %v970_v32  ;;  %536 = vst [vmem:[#allocation2 + $0x50] sm:$0xff] (!%p907_p11), %v1316_v33 }
 0x121   : > { %v971_v36 = vpop.f32.mrb[2].mxu0  ;;  %v979_v37 = vpop.f32.mrb[2].mxu1  ;;  %526 = vst [vmem:[#allocation2] sm:$0xff] (!%p907_p11), %v459_v34  ;;  %534 = vst [vmem:[#allocation2 + $0x40] sm:$0xff] (!%p907_p11), %v491_v35 }
 0x122   : > { %v462_v38 = vpop.f32.mrb[3].mxu0  ;;  %v494_v39 = vpop.f32.mrb[3].mxu1  ;;  %529 = vst [vmem:[#allocation2 + $0x18] sm:$0xff] (!%p907_p11), %v971_v36  ;;  %537 = vst [vmem:[#allocation2 + $0x58] sm:$0xff] (!%p907_p11), %v979_v37 }
 0x123   : > { %527 = vst [vmem:[#allocation2 + $0x8] sm:$0xff] (!%p907_p11), %v462_v38  ;;  %535 = vst [vmem:[#allocation2 + $0x48] sm:$0xff] (!%p907_p11), %v494_v39 }
 0x124   : > { %525 = sbr.rel (%p907_p11) target bundleno = 300 (0x12c), region = 77 }
 0x127   : > { %v974_v40 = vpop.f32.mrb[4].mxu0  ;;  %v1318_v41 = vpop.f32.mrb[4].mxu1 }
 0x128   : > { %v475_v42 = vpop.f32.mrb[5].mxu0  ;;  %v507_v43 = vpop.f32.mrb[5].mxu1  ;;  %532 = vst [vmem:[#allocation2 + $0x30] sm:$0xff] (!%p907_p11), %v974_v40  ;;  %540 = vst [vmem:[#allocation2 + $0x70] sm:$0xff] (!%p907_p11), %v1318_v41 }
 0x129   : > { %v975_v44 = vpop.f32.mrb[6].mxu0  ;;  %v1320_v45 = vpop.f32.mrb[6].mxu1  ;;  %530 = vst [vmem:[#allocation2 + $0x20] sm:$0xff] (!%p907_p11), %v475_v42  ;;  %538 = vst [vmem:[#allocation2 + $0x60] sm:$0xff] (!%p907_p11), %v507_v43 }
 0x12a   : > { %v478_v46 = vpop.f32.mrb[7].mxu0  ;;  %v510_v47 = vpop.f32.mrb[7].mxu1  ;;  %533 = vst [vmem:[#allocation2 + $0x38] sm:$0xff] (!%p907_p11), %v975_v44  ;;  %541 = vst [vmem:[#allocation2 + $0x78] sm:$0xff] (!%p907_p11), %v1320_v45 }
 0x12b   : > { %531 = vst [vmem:[#allocation2 + $0x28] sm:$0xff] %v478_v46  ;;  %539 = vst [vmem:[#allocation2 + $0x68] sm:$0xff] %v510_v47 }
 0x12c PF: > { %p908_p12 = scmp.le.s32.totalorder %s1167_s14, 0 }
 0x12d   : > { %v546_v48 = vld [vmem:[#allocation2] sm:$0xff] (!%p908_p12)  ;;  %v547_v49 = vld [vmem:[#allocation2 + $0x8] sm:$0xff] (!%p908_p12)  ;;  %v548_v50 = vld [vmem:[#allocation2 + $0x10] sm:$0xff] (!%p908_p12) }
 0x12e   : > { %545 = sbr.rel (%p908_p12) target bundleno = 313 (0x139), region = 81  ;;  %v562_v51 = vadd.f32 (!%p908_p12), %v546_v48, %v459_v34  ;;  %v563_v52 = vadd.f32 (!%p908_p12), %v547_v49, %v462_v38  ;;  %v564_v53 = vadd.f32 (!%p908_p12), %v970_v32, %v548_v50  ;;  %v549_v54 = vld [vmem:[#allocation2 + $0x18] sm:$0xff] (!%p908_p12)  ;;  %v554_v62 = vld [vmem:[#allocation2 + $0x40] sm:$0xff] (!%p908_p12)  ;;  %v555_v2 = vld [vmem:[#allocation2 + $0x48] sm:$0xff] (!%p908_p12) }
 0x12f   : > { %v565_v57 = vadd.f32 (!%p908_p12), %v971_v36, %v549_v54  ;;  %v570_v1 = vadd.f32 (!%p908_p12), %v554_v62, %v491_v35  ;;  %v556_v3 = vld [vmem:[#allocation2 + $0x50] sm:$0xff] (!%p908_p12)  ;;  %v557_v4 = vld [vmem:[#allocation2 + $0x58] sm:$0xff] (!%p908_p12)  ;;  %v571_v5 = vadd.f32 (!%p908_p12), %v555_v2, %v494_v39 }
 0x130   : > { %v552_v60 = vld [vmem:[#allocation2 + $0x30] sm:$0xff] (!%p908_p12)  ;;  %578 = vst [vmem:[#allocation2] sm:$0xff] (!%p908_p12), %v562_v51  ;;  %579 = vst [vmem:[#allocation2 + $0x8] sm:$0xff] (!%p908_p12), %v563_v52  ;;  %v572_v6 = vadd.f32 (!%p908_p12), %v1316_v33, %v556_v3  ;;  %v573_v7 = vadd.f32 (!%p908_p12), %v979_v37, %v557_v4 }
 0x131   : > { %v550_v55 = vld [vmem:[#allocation2 + $0x20] sm:$0xff] (!%p908_p12)  ;;  %580 = vst [vmem:[#allocation2 + $0x10] sm:$0xff] (!%p908_p12), %v564_v53  ;;  %v568_v63 = vadd.f32 (!%p908_p12), %v974_v40, %v552_v60  ;;  %581 = vst [vmem:[#allocation2 + $0x18] sm:$0xff] (!%p908_p12), %v565_v57  ;;  %v560_v10 = vld [vmem:[#allocation2 + $0x70] sm:$0xff] (!%p908_p12) }
 0x132   : > { %v551_v56 = vld [vmem:[#allocation2 + $0x28] sm:$0xff] (!%p908_p12)  ;;  %v566_v58 = vadd.f32 (!%p908_p12), %v550_v55, %v475_v42  ;;  %v553_v61 = vld [vmem:[#allocation2 + $0x38] sm:$0xff] (!%p908_p12)  ;;  %v558_v8 = vld [vmem:[#allocation2 + $0x60] sm:$0xff] (!%p908_p12)  ;;  %586 = vst [vmem:[#allocation2 + $0x40] sm:$0xff] (!%p908_p12), %v570_v1  ;;  %v576_v13 = vadd.f32 (!%p908_p12), %v1318_v41, %v560_v10 }
 0x133   : > { %v567_v59 = vadd.f32 (!%p908_p12), %v551_v56, %v478_v46  ;;  %v569_v0 = vadd.f32 (!%p908_p12), %v975_v44, %v553_v61  ;;  %v559_v9 = vld [vmem:[#allocation2 + $0x68] sm:$0xff] (!%p908_p12)  ;;  %584 = vst [vmem:[#allocation2 + $0x30] sm:$0xff] (!%p908_p12), %v568_v63  ;;  %v574_v11 = vadd.f32 (!%p908_p12), %v558_v8, %v507_v43  ;;  %v561_v14 = vld [vmem:[#allocation2 + $0x78] sm:$0xff] (!%p908_p12)  ;;  %587 = vst [vmem:[#allocation2 + $0x48] sm:$0xff] (!%p908_p12), %v571_v5 }
 0x134   : > { %582 = vst [vmem:[#allocation2 + $0x20] sm:$0xff] (!%p908_p12), %v566_v58  ;;  %v575_v12 = vadd.f32 (!%p908_p12), %v559_v9, %v510_v47  ;;  %588 = vst [vmem:[#allocation2 + $0x50] sm:$0xff] (!%p908_p12), %v572_v6  ;;  %v577_v15 = vadd.f32 (!%p908_p12), %v1320_v45, %v561_v14 }
 0x135   : > { %583 = vst [vmem:[#allocation2 + $0x28] sm:$0xff] %v567_v59  ;;  %585 = vst [vmem:[#allocation2 + $0x38] sm:$0xff] %v569_v0 }
 0x136   : > { %589 = vst [vmem:[#allocation2 + $0x58] sm:$0xff] %v573_v7  ;;  %590 = vst [vmem:[#allocation2 + $0x60] sm:$0xff] %v574_v11 }
 0x137   : > { %591 = vst [vmem:[#allocation2 + $0x68] sm:$0xff] %v575_v12  ;;  %592 = vst [vmem:[#allocation2 + $0x70] sm:$0xff] %v576_v13 }
 0x138   : > { %593 = vst [vmem:[#allocation2 + $0x78] sm:$0xff] %v577_v15 }
 0x139 PF: > { %p909_p13 = scmp.ne.s32.totalorder %s1167_s14, 2 }
 0x13a   : > { %v1121_v16 = vld [vmem:[%s1394_s2] sm:$0xff] (!%p909_p13)   ;;  %v1122_v17 = vld [vmem:[%s1394_s2 + $0x8] sm:$0xff] (!%p909_p13)   ;;  %v1123_v18 = vld [vmem:[%s1394_s2 + $0x10] sm:$0xff] (!%p909_p13)  }
 0x13b   : > { %597 = sbr.rel (%p909_p13) target bundleno = 571 (0x23b), region = 85  ;;  %984 = vmatprep.subr.bf16.mxu0 (!%p909_p13), %v1121_v16  ;;  %1032 = vmatprep.subr.bf16.mxu1 (!%p909_p13), %v1121_v16  ;;  %v1124_v19 = vld [vmem:[%s1394_s2 + $0x18] sm:$0xff] (!%p909_p13)   ;;  %v598_v20 = vld [vmem:[#allocation2] sm:$0xff] (!%p909_p13)  ;;  %v599_v21 = vld [vmem:[#allocation2 + $0x8] sm:$0xff] (!%p909_p13) }
 0x13c   : > { %985 = vmatpush3.bf16.msra.mxu0 (!%p909_p13), %v1121_v16  ;;  %1040 = vmatpush3.bf16.msra.mxu1 (!%p909_p13), %v1121_v16  ;;  %v614_v23 = vpack.c.bf16 (!%p909_p13), %v599_v21, %v598_v20  ;;  %v1125_v26 = vld [vmem:[%s1394_s2 + $0x20] sm:$0xff] (!%p909_p13)   ;;  %v1126_v27 = vld [vmem:[%s1394_s2 + $0x28] sm:$0xff] (!%p909_p13)   ;;  %v1127_v28 = vld [vmem:[%s1394_s2 + $0x30] sm:$0xff] (!%p909_p13)  }
 0x13d   : > { %986 = vmatprep.subr.bf16.mxu0 (!%p909_p13), %v1122_v17  ;;  %1033 = vmatprep.subr.bf16.mxu1 (!%p909_p13), %v1122_v17  ;;  %v606_v22 = vld [vmem:[#allocation2 + $0x40] sm:$0xff] (!%p909_p13)  ;;  %v1128_v29 = vld [vmem:[%s1394_s2 + $0x38] sm:$0xff] (!%p909_p13)   ;;  %v600_v30 = vld [vmem:[#allocation2 + $0x10] sm:$0xff] (!%p909_p13) }
 0x13e   : > { %v607_v24 = vld [vmem:[#allocation2 + $0x48] sm:$0xff] (!%p909_p13)  ;;  %1000 = vmatprep.mubr.bf16.mxu0 (!%p909_p13), %v614_v23  ;;  %v601_v31 = vld [vmem:[#allocation2 + $0x18] sm:$0xff] (!%p909_p13)  ;;  %v610_v36 = vld [vmem:[#allocation2 + $0x60] sm:$0xff] (!%p909_p13) }
 0x13f   : > { %v618_v25 = vpack.c.bf16 (!%p909_p13), %v607_v24, %v606_v22  ;;  %v608_v32 = vld [vmem:[#allocation2 + $0x50] sm:$0xff] (!%p909_p13)  ;;  %v609_v33 = vld [vmem:[#allocation2 + $0x58] sm:$0xff] (!%p909_p13)  ;;  %v602_v34 = vld [vmem:[#allocation2 + $0x20] sm:$0xff] (!%p909_p13)  ;;  %v615_v38 = vpack.c.bf16 (!%p909_p13), %v601_v31, %v600_v30 }
 0x140   : > { %987 = vmatpush3.bf16.msra.mxu0 (!%p909_p13), %v1122_v17  ;;  %1041 = vmatpush3.bf16.msra.mxu1 (!%p909_p13), %v1122_v17  ;;  %v603_v35 = vld [vmem:[#allocation2 + $0x28] sm:$0xff] (!%p909_p13)  ;;  %v619_v39 = vpack.c.bf16 (!%p909_p13), %v609_v33, %v608_v32  ;;  %v604_v42 = vld [vmem:[#allocation2 + $0x30] sm:$0xff] (!%p909_p13)  ;;  %v605_v43 = vld [vmem:[#allocation2 + $0x38] sm:$0xff] (!%p909_p13) }
 0x141   : > { %988 = vmatprep.subr.bf16.mxu0 (!%p909_p13), %v1123_v18  ;;  %1034 = vmatprep.subr.bf16.mxu1 (!%p909_p13), %v1123_v18  ;;  %v611_v37 = vld [vmem:[#allocation2 + $0x68] sm:$0xff] (!%p909_p13)  ;;  %v616_v40 = vpack.c.bf16 (!%p909_p13), %v603_v35, %v602_v34  ;;  %v612_v44 = vld [vmem:[#allocation2 + $0x70] sm:$0xff] (!%p909_p13)  ;;  %v613_v45 = vld [vmem:[#allocation2 + $0x78] sm:$0xff] (!%p909_p13)  ;;  %v617_v46 = vpack.c.bf16 (!%p909_p13), %v605_v43, %v604_v42 }
 0x142   : > { %1008 = vmatprep.mubr.bf16.mxu1 %v618_v25  ;;  %v620_v41 = vpack.c.bf16 %v611_v37, %v610_v36  ;;  %v621_v47 = vpack.c.bf16 %v613_v45, %v612_v44 }
 0x144   : > { %989 = vmatpush3.bf16.msra.mxu0 %v1123_v18  ;;  %1042 = vmatpush3.bf16.msra.mxu1 %v1123_v18 }
 0x145   : > { %990 = vmatprep.subr.bf16.mxu0 %v1124_v19  ;;  %1035 = vmatprep.subr.bf16.mxu1 %v1124_v19 }
 0x148   : > { %991 = vmatpush3.bf16.msra.mxu0 %v1124_v19  ;;  %1043 = vmatpush3.bf16.msra.mxu1 %v1124_v19 }
 0x149   : > { %992 = vmatprep.subr.bf16.mxu0 %v1125_v26  ;;  %1036 = vmatprep.subr.bf16.mxu1 %v1125_v26 }
 0x14c   : > { %993 = vmatpush3.bf16.msra.mxu0 %v1125_v26  ;;  %1044 = vmatpush3.bf16.msra.mxu1 %v1125_v26 }
 0x14d   : > { %994 = vmatprep.subr.bf16.mxu0 %v1126_v27  ;;  %1037 = vmatprep.subr.bf16.mxu1 %v1126_v27 }
 0x150   : > { %995 = vmatpush3.bf16.msra.mxu0 %v1126_v27  ;;  %1045 = vmatpush3.bf16.msra.mxu1 %v1126_v27 }
 0x151   : > { %996 = vmatprep.subr.bf16.mxu0 %v1127_v28  ;;  %1038 = vmatprep.subr.bf16.mxu1 %v1127_v28 }
 0x154   : > { %997 = vmatpush3.bf16.msra.mxu0 %v1127_v28  ;;  %1046 = vmatpush3.bf16.msra.mxu1 %v1127_v28 }
 0x155   : > { %998 = vmatprep.subr.bf16.mxu0 %v1128_v29  ;;  %1039 = vmatprep.subr.bf16.mxu1 %v1128_v29 }
 0x158   : > { %999 = vmatpush3.bf16.msra.mxu0 %v1128_v29  ;;  %1047 = vmatpush3.bf16.msra.mxu1 %v1128_v29 }
 0x15b   : > { %1001 = vmatmul.mubr.bf16.vlgmr.msra.gmra.mrb[0].mxu0 %v615_v38  ;;  %1009 = vmatmul.mubr.bf16.vlgmr.msra.gmra.mrb[0].mxu1 %v619_v39 }
 0x15c   : > { %1004 = vmatprep.mubr.bf16.mxu0 %v616_v40  ;;  %1012 = vmatprep.mubr.bf16.mxu1 %v620_v41 }
 0x163   : > { %1005 = vmatmul.mubr.bf16.gmra.mrb[4].mxu0 %v617_v46  ;;  %1013 = vmatmul.mubr.bf16.gmra.mrb[4].mxu1 %v621_v47 }
 0x22e   : > { %v1002_v48 = vpop.f32.mrb[0].mxu0  ;;  %v1010_v49 = vpop.f32.mrb[0].mxu1 }
 0x22f   : > { %785 = vst [vmem:[%s1297_s15 + $0x10] sm:$0xff] %v1002_v48  ;;  %793 = vst [vmem:[%s1297_s15 + $0x50] sm:$0xff] %v1010_v49  ;;  %v720_v50 = vpop.f32.mrb[1].mxu0  ;;  %v752_v51 = vpop.f32.mrb[1].mxu1 }
 0x230   : > { %783 = vst [vmem:[%s1297_s15] sm:$0xff] %v720_v50  ;;  %791 = vst [vmem:[%s1297_s15 + $0x40] sm:$0xff] %v752_v51  ;;  %v1003_v52 = vpop.f32.mrb[2].mxu0  ;;  %v1011_v53 = vpop.f32.mrb[2].mxu1 }
 0x231   : > { %786 = vst [vmem:[%s1297_s15 + $0x18] sm:$0xff] %v1003_v52  ;;  %794 = vst [vmem:[%s1297_s15 + $0x58] sm:$0xff] %v1011_v53  ;;  %v723_v54 = vpop.f32.mrb[3].mxu0  ;;  %v755_v55 = vpop.f32.mrb[3].mxu1 }
 0x232   : > { %784 = vst [vmem:[%s1297_s15 + $0x8] sm:$0xff] %v723_v54  ;;  %792 = vst [vmem:[%s1297_s15 + $0x48] sm:$0xff] %v755_v55 }
 0x236   : > { %v1006_v56 = vpop.f32.mrb[4].mxu0  ;;  %v1014_v57 = vpop.f32.mrb[4].mxu1 }
 0x237   : > { %789 = vst [vmem:[%s1297_s15 + $0x30] sm:$0xff] %v1006_v56  ;;  %797 = vst [vmem:[%s1297_s15 + $0x70] sm:$0xff] %v1014_v57  ;;  %v736_v58 = vpop.f32.mrb[5].mxu0  ;;  %v768_v59 = vpop.f32.mrb[5].mxu1 }
 0x238   : > { %787 = vst [vmem:[%s1297_s15 + $0x20] sm:$0xff] %v736_v58  ;;  %795 = vst [vmem:[%s1297_s15 + $0x60] sm:$0xff] %v768_v59  ;;  %v1007_v60 = vpop.f32.mrb[6].mxu0  ;;  %v1015_v61 = vpop.f32.mrb[6].mxu1 }
 0x239   : > { %790 = vst [vmem:[%s1297_s15 + $0x38] sm:$0xff] %v1007_v60  ;;  %798 = vst [vmem:[%s1297_s15 + $0x78] sm:$0xff] %v1015_v61  ;;  %v739_v62 = vpop.f32.mrb[7].mxu0  ;;  %v771_v63 = vpop.f32.mrb[7].mxu1 }
 0x23a   : > { %788 = vst [vmem:[%s1297_s15 + $0x28] sm:$0xff] %v739_v62  ;;  %796 = vst [vmem:[%s1297_s15 + $0x68] sm:$0xff] %v771_v63 }
 0x23b PF: > { %s13_s18 = sadd.s32 1, %s1183_s18   ;;  %s1396_s12 = smov %s1163_s13 }
 0x23c   : > { %p10_p0 = scmp.ge.s32.totalorder %s13_s18, 11   ;;  %s1397_s13 = smov %s1256_s25 }
 0x23d   : > { %s1398_s14 = smov %s1175_s16  ;;  %s1399_s15 = smov %s1179_s17 }
 0x23e   : > { %s1400_s16 = smov %s1403_s19  ;;  %s1401_s17 = smov %s1407_s20 }
 0x23f   :  { %12 = sbr.rel (!%p10_p0) target bundleno = 4 (0x4), region = 121 }

// kernel: geomix3_forward.2
= control target key start
LH: loop header
LB: loop body
LE: loop exit
PB: predicated region body
PF: predicated region fallthrough
CT: control target
= control target key end

     0   :  { %s1476_s18 = smov 0   ;;  %s1478_s19 = smov 0   ;;  %s1679_s0 = inlined_call_operand.vmem [shape: bf16[384,384], index: 0, kind: input, shape index: {}]   ;;  %s1680_s1 = inlined_call_operand.vmem [shape: bf16[384,128], index: 1, kind: input, shape index: {}]   ;;  %s1681_s2 = inlined_call_operand.vmem [shape: bf16[128,128], index: 2, kind: input, shape index: {}]   ;;  %s1682_s3 = inlined_call_operand.vmem [shape: f32[1,128], index: 3, kind: input, shape index: {}]   ;;  %s1683_s4 = inlined_call_operand.vmem [shape: f32[1,128], index: 4, kind: input, shape index: {}]   ;;  %s1684_s5 = inlined_call_operand.vmem [shape: bf16[384,128], index: 5, kind: output, shape index: {}]  }
   0x1   :  { %s1480_s20 = smov 0   ;;  %s1482_s21 = smov 0  }
   0x2   :  { %s1484_s22 = smov 0   ;;  %s1486_s23 = smov 0  }
   0x3   :  { %s1488_s24 = smov 0  }
   0x4 LB: > { %s24_s25 = sadd.s32 1, %s1436_s22  ;;  %s27_s26 = sadd.s32 1, %s1440_s23  ;;  %s1444_s24 = sphi %s1488_s24, %s15_s24   ;;  %s1440_s23 = sphi %s1486_s23, %s1690_s23   ;;  %s1436_s22 = sphi %s1484_s22, %s1689_s22   ;;  %s1432_s21 = sphi %s1482_s21, %s1688_s21   ;;  %s1428_s20 = sphi %s1480_s20, %s1687_s20   ;;  %s1424_s19 = sphi %s1478_s19, %s1686_s19   ;;  %s1420_s18 = sphi %s1476_s18, %s1685_s18  }
   0x5   : > { %p25_p0 = scmp.ge.s32.totalorder %s24_s25, 3  ;;  %p43_p1 = scmp.ne.s32.totalorder %s1424_s19, %s1420_s18 }
   0x6   : > { %p44_p2 = scmp.eq.s32.totalorder %s1444_s24, 0  ;;  %s36_s30 = sadd.s32 1, %s1424_s19 }
   0x7   : > { %s1692_s25 = smov (%p25_p0, %s24_s25), 0  ;;  %s1694_s26 = smov (!%p25_p0, %s27_s26), %s1440_s23 }
   0x8   : > { %p45_p3 = por %p44_p2, %p43_p1  ;;  %p29_p4 = scmp.ge.s32.totalorder %s1694_s26, 3 }
   0x9   : > { %s32_s27 = ssub.s32 %s1436_s22, %s1692_s25  ;;  %p1060_p6 = scmp.ge.s32.totalorder %s1444_s24, 9 }
   0xa   : > { %s1696_s26 = smov (%p29_p4, %s1694_s26), 0 }
   0xb   : > { %s31_s28 = ssub.s32 %s1440_s23, %s1696_s26  ;;  %191 = sbr.rel (%p1060_p6) target bundleno = 35 (0x23), region = 32 }
   0xc   : > { %s33_s29 = sor.u32 %s32_s27, %s31_s28 }
   0xd   : > { %p34_p5 = scmp.eq.s32.totalorder %s33_s29, 0 }
   0xf   : > { %s1527_s6 = scalar_select %p34_p5, %s1424_s19, %s36_s30  }
  0x12   : > { %194 = sbr.rel (!%p45_p3) target bundleno = 35 (0x23), region = 36  ;;  %s196_s7 = sand.u32 (%p45_p3), 1, %s1424_s19  }
  0x13   : > { %s1309_s8 = smul.u32 (%p45_p3), 48, %s1440_s23  ;;  %s1061_s9 = sshll.u32 (%p45_p3), %s196_s7, 6 }
  0x14   : > { %s198_s15 = scalar_lea.vmem (%p45_p3), [#allocation3], %s1061_s9 }
  0x15   : > { %s201_s10 = sadd.s32 (%p45_p3), %s1436_s22, %s1309_s8 }
  0x16   : > { %s1064_s11 = sshll.u32 (%p45_p3), %s201_s10, 2 }
  0x17   : > { %s1536_s14 = scalar_lea.vmem (%p45_p3), %s1679_s0, %s1064_s11 }
  0x18   : > { %v219_v0 = vld [vmem:[%s1536_s14] sm:$0xf] (%p45_p3)  ;;  %v221_v1 = vld [vmem:[%s1536_s14 + $0xc] sm:$0xf] (%p45_p3)  ;;  %v223_v2 = vld [vmem:[%s1536_s14 + $0x18] sm:$0xf] (%p45_p3) }
  0x19   : > { %220 = vst [vmem:[%s198_s15] sm:$0xf] %v219_v0  ;;  %222 = vst [vmem:[%s198_s15 + $0x4] sm:$0xf] %v221_v1  ;;  %v225_v3 = vld [vmem:[%s1536_s14 + $0x24] sm:$0xf] }
  0x1a   : > { %224 = vst [vmem:[%s198_s15 + $0x8] sm:$0xf] %v223_v2  ;;  %v227_v4 = vld [vmem:[%s1536_s14 + $0x30] sm:$0xf]  ;;  %v229_v5 = vld [vmem:[%s1536_s14 + $0x3c] sm:$0xf] }
  0x1b   : > { %226 = vst [vmem:[%s198_s15 + $0xc] sm:$0xf] %v225_v3  ;;  %228 = vst [vmem:[%s198_s15 + $0x10] sm:$0xf] %v227_v4  ;;  %v231_v6 = vld [vmem:[%s1536_s14 + $0x48] sm:$0xf] }
  0x1c   : > { %230 = vst [vmem:[%s198_s15 + $0x14] sm:$0xf] %v229_v5  ;;  %v233_v7 = vld [vmem:[%s1536_s14 + $0x54] sm:$0xf]  ;;  %v235_v8 = vld [vmem:[%s1536_s14 + $0x60] sm:$0xf] }
  0x1d   : > { %232 = vst [vmem:[%s198_s15 + $0x18] sm:$0xf] %v231_v6  ;;  %234 = vst [vmem:[%s198_s15 + $0x1c] sm:$0xf] %v233_v7  ;;  %v237_v9 = vld [vmem:[%s1536_s14 + $0x6c] sm:$0xf] }
  0x1e   : > { %236 = vst [vmem:[%s198_s15 + $0x20] sm:$0xf] %v235_v8  ;;  %v239_v10 = vld [vmem:[%s1536_s14 + $0x78] sm:$0xf]  ;;  %v241_v11 = vld [vmem:[%s1536_s14 + $0x84] sm:$0xf] }
  0x1f   : > { %238 = vst [vmem:[%s198_s15 + $0x24] sm:$0xf] %v237_v9  ;;  %240 = vst [vmem:[%s198_s15 + $0x28] sm:$0xf] %v239_v10  ;;  %v243_v12 = vld [vmem:[%s1536_s14 + $0x90] sm:$0xf] }
  0x20   : > { %242 = vst [vmem:[%s198_s15 + $0x2c] sm:$0xf] %v241_v11  ;;  %v245_v13 = vld [vmem:[%s1536_s14 + $0x9c] sm:$0xf]  ;;  %v247_v14 = vld [vmem:[%s1536_s14 + $0xa8] sm:$0xf] }
  0x21   : > { %244 = vst [vmem:[%s198_s15 + $0x30] sm:$0xf] %v243_v12  ;;  %246 = vst [vmem:[%s198_s15 + $0x34] sm:$0xf] %v245_v13  ;;  %v249_v15 = vld [vmem:[%s1536_s14 + $0xb4] sm:$0xf] }
  0x22   : > { %248 = vst [vmem:[%s198_s15 + $0x38] sm:$0xf] %v247_v14  ;;  %250 = vst [vmem:[%s198_s15 + $0x3c] sm:$0xf] %v249_v15 }
  0x23 PF: > { %p1065_p7 = scmp.ge.s32.totalorder %s1444_s24, 1  ;;  %p304_p8 = scmp.lt.s32.totalorder %s1444_s24, 10 }
  0x25   : > { %p305_p9 = pnand %p1065_p7, %p304_p8 }
  0x26   : > { %s1067_s16 = sshll.u32 (!%p305_p9), %s1432_s21, 4  ;;  %s1069_s17 = sshll.u32 (!%p305_p9), %s1428_s20, 7 }
  0x27   : > { %308 = sbr.rel (%p305_p9) target bundleno = 580 (0x244), region = 77  ;;  %p340_p10 = scmp.lt.s32.totalorder (!%p305_p9), %s1067_s16, 47 }
  0x28   : > { %s363_s27 = sshra.s32 (!%p305_p9), %s1069_s17, 3  ;;  %s311_s8 = sand.u32 (!%p305_p9), 1, %s1420_s18  }
  0x29   : > { %s1070_s28 = sshll.u32 (!%p305_p9), %s363_s27, 2  ;;  %s1066_s12 = sshll.u32 (!%p305_p9), %s311_s8, 6 }
  0x2a   : > { %s1561_s7 = scalar_lea.vmem (!%p305_p9), %s1680_s1, %s1070_s28  ;;  %s1573_s18 = scalar_lea.vmem (!%p305_p9), [#allocation3], %s1066_s12 }
  0x2b   : > { %v1366_v16 = vld [vmem:[%s1561_s7] sm:$0xff] (!%p305_p9)   ;;  %v1367_v17 = vld [vmem:[%s1561_s7 + $0x8] sm:$0xff] (!%p305_p9)   ;;  %v1368_v18 = vld [vmem:[%s1561_s7 + $0x10] sm:$0xff] (!%p305_p9)   ;;  %p1087_p11 = scmp.ne.s32.totalorder (!%p305_p9), %s1428_s20, 0 }
  0x2c   : > { %1213 = vmatprep.subr.bf16.mxu0 (!%p305_p9), %v1366_v16  ;;  %1277 = vmatprep.subr.bf16.mxu1 (!%p305_p9), %v1366_v16  ;;  %v1369_v19 = vld [vmem:[%s1561_s7 + $0x18] sm:$0xff] (!%p305_p9)   ;;  %v1374_v20 = vld [vmem:[%s1573_s18] sm:$0xff] (!%p305_p9)   ;;  %v1371_v23 = vld [vmem:[%s1561_s7 + $0x28] sm:$0xff] (!%p305_p9)  }
  0x2d   : > { %1214 = vmatpush3.bf16.msra.mxu0 (!%p305_p9), %v1366_v16  ;;  %1285 = vmatpush3.bf16.msra.mxu1 (!%p305_p9), %v1366_v16  ;;  %v1375_v21 = vld [vmem:[%s1573_s18 + $0x20] sm:$0xff] (!%p305_p9)   ;;  %v1372_v24 = vld [vmem:[%s1561_s7 + $0x30] sm:$0xff] (!%p305_p9)   ;;  %v1373_v25 = vld [vmem:[%s1561_s7 + $0x38] sm:$0xff] (!%p305_p9)  }
  0x2e   : > { %s1698_s16 = smov (!%p340_p10, %s1067_s16), 47  ;;  %1215 = vmatprep.subr.bf16.mxu0 %v1367_v17  ;;  %1278 = vmatprep.subr.bf16.mxu1 %v1367_v17  ;;  %v1370_v22 = vld [vmem:[%s1561_s7 + $0x20] sm:$0xff]   ;;  %v1376_v26 = vld [vmem:[%s1573_s18 + $0x8] sm:$0xff]   ;;  %v1378_v28 = vld [vmem:[%s1573_s18 + $0x10] sm:$0xff]  }
  0x2f   : > { %s1068_s9 = sshll.u32 %s1698_s16, 2  ;;  %1229 = vmatprep.mubr.bf16.mxu0 %v1374_v20  ;;  %1237 = vmatprep.mubr.bf16.mxu1 %v1375_v21  ;;  %v1377_v27 = vld [vmem:[%s1573_s18 + $0x28] sm:$0xff]   ;;  %v1379_v29 = vld [vmem:[%s1573_s18 + $0x30] sm:$0xff]   ;;  %v1380_v30 = vld [vmem:[%s1573_s18 + $0x18] sm:$0xff]  }
  0x30   : > { %s1568_s21 = scalar_lea.vmem %s1684_s5, %s1068_s9  ;;  %v1381_v31 = vld [vmem:[%s1573_s18 + $0x38] sm:$0xff]  }
  0x31   : > { %1216 = vmatpush3.bf16.msra.mxu0 %v1367_v17  ;;  %1286 = vmatpush3.bf16.msra.mxu1 %v1367_v17 }
  0x32   : > { %1217 = vmatprep.subr.bf16.mxu0 %v1368_v18  ;;  %1279 = vmatprep.subr.bf16.mxu1 %v1368_v18 }
  0x35   : > { %1218 = vmatpush3.bf16.msra.mxu0 %v1368_v18  ;;  %1287 = vmatpush3.bf16.msra.mxu1 %v1368_v18 }
  0x36   : > { %1219 = vmatprep.subr.bf16.mxu0 %v1369_v19  ;;  %1280 = vmatprep.subr.bf16.mxu1 %v1369_v19 }
  0x39   : > { %1220 = vmatpush3.bf16.msra.mxu0 %v1369_v19  ;;  %1288 = vmatpush3.bf16.msra.mxu1 %v1369_v19 }
  0x3a   : > { %1221 = vmatprep.subr.bf16.mxu0 %v1370_v22  ;;  %1281 = vmatprep.subr.bf16.mxu1 %v1370_v22 }
  0x3d   : > { %1222 = vmatpush3.bf16.msra.mxu0 %v1370_v22  ;;  %1289 = vmatpush3.bf16.msra.mxu1 %v1370_v22 }
  0x3e   : > { %1223 = vmatprep.subr.bf16.mxu0 %v1371_v23  ;;  %1282 = vmatprep.subr.bf16.mxu1 %v1371_v23 }
  0x41   : > { %1224 = vmatpush3.bf16.msra.mxu0 %v1371_v23  ;;  %1290 = vmatpush3.bf16.msra.mxu1 %v1371_v23 }
  0x42   : > { %1225 = vmatprep.subr.bf16.mxu0 %v1372_v24  ;;  %1283 = vmatprep.subr.bf16.mxu1 %v1372_v24 }
  0x45   : > { %1226 = vmatpush3.bf16.msra.mxu0 %v1372_v24  ;;  %1291 = vmatpush3.bf16.msra.mxu1 %v1372_v24 }
  0x46   : > { %1227 = vmatprep.subr.bf16.mxu0 %v1373_v25  ;;  %1284 = vmatprep.subr.bf16.mxu1 %v1373_v25 }
  0x49   : > { %1228 = vmatpush3.bf16.msra.mxu0 %v1373_v25  ;;  %1292 = vmatpush3.bf16.msra.mxu1 %v1373_v25 }
  0x4c   : > { %1230 = vmatmul.mubr.bf16.vlgmr.msra.gmra.mrb[0].mxu0 %v1376_v26  ;;  %1238 = vmatmul.mubr.bf16.vlgmr.msra.gmra.mrb[0].mxu1 %v1377_v27 }
  0x4d   : > { %1233 = vmatprep.mubr.bf16.mxu0 %v1378_v28  ;;  %1241 = vmatprep.mubr.bf16.mxu1 %v1379_v29 }
  0x54   : > { %1234 = vmatmul.mubr.bf16.gmra.mrb[4].mxu0 %v1380_v30  ;;  %1242 = vmatmul.mubr.bf16.gmra.mrb[4].mxu1 %v1381_v31 }
 0x11f   : > { %v1231_v32 = vpop.f32.mrb[0].mxu0  ;;  %v1587_v33 = vpop.f32.mrb[0].mxu1 }
 0x120   : > { %v513_v34 = vpop.f32.mrb[1].mxu0  ;;  %v545_v35 = vpop.f32.mrb[1].mxu1  ;;  %582 = vst [vmem:[#allocation2 + $0x10] sm:$0xff] (!%p1087_p11), %v1231_v32  ;;  %590 = vst [vmem:[#allocation2 + $0x50] sm:$0xff] (!%p1087_p11), %v1587_v33 }
 0x121   : > { %v1232_v36 = vpop.f32.mrb[2].mxu0  ;;  %v1240_v37 = vpop.f32.mrb[2].mxu1  ;;  %580 = vst [vmem:[#allocation2] sm:$0xff] (!%p1087_p11), %v513_v34  ;;  %588 = vst [vmem:[#allocation2 + $0x40] sm:$0xff] (!%p1087_p11), %v545_v35 }
 0x122   : > { %v516_v38 = vpop.f32.mrb[3].mxu0  ;;  %v548_v39 = vpop.f32.mrb[3].mxu1  ;;  %583 = vst [vmem:[#allocation2 + $0x18] sm:$0xff] (!%p1087_p11), %v1232_v36  ;;  %591 = vst [vmem:[#allocation2 + $0x58] sm:$0xff] (!%p1087_p11), %v1240_v37 }
 0x123   : > { %581 = vst [vmem:[#allocation2 + $0x8] sm:$0xff] (!%p1087_p11), %v516_v38  ;;  %589 = vst [vmem:[#allocation2 + $0x48] sm:$0xff] (!%p1087_p11), %v548_v39 }
 0x124   : > { %579 = sbr.rel (%p1087_p11) target bundleno = 300 (0x12c), region = 85 }
 0x127   : > { %v1235_v40 = vpop.f32.mrb[4].mxu0  ;;  %v1589_v41 = vpop.f32.mrb[4].mxu1 }
 0x128   : > { %v529_v42 = vpop.f32.mrb[5].mxu0  ;;  %v561_v43 = vpop.f32.mrb[5].mxu1  ;;  %586 = vst [vmem:[#allocation2 + $0x30] sm:$0xff] (!%p1087_p11), %v1235_v40  ;;  %594 = vst [vmem:[#allocation2 + $0x70] sm:$0xff] (!%p1087_p11), %v1589_v41 }
 0x129   : > { %v1236_v44 = vpop.f32.mrb[6].mxu0  ;;  %v1591_v45 = vpop.f32.mrb[6].mxu1  ;;  %584 = vst [vmem:[#allocation2 + $0x20] sm:$0xff] (!%p1087_p11), %v529_v42  ;;  %592 = vst [vmem:[#allocation2 + $0x60] sm:$0xff] (!%p1087_p11), %v561_v43 }
 0x12a   : > { %v532_v46 = vpop.f32.mrb[7].mxu0  ;;  %v564_v47 = vpop.f32.mrb[7].mxu1  ;;  %587 = vst [vmem:[#allocation2 + $0x38] sm:$0xff] (!%p1087_p11), %v1236_v44  ;;  %595 = vst [vmem:[#allocation2 + $0x78] sm:$0xff] (!%p1087_p11), %v1591_v45 }
 0x12b   : > { %585 = vst [vmem:[#allocation2 + $0x28] sm:$0xff] %v532_v46  ;;  %593 = vst [vmem:[#allocation2 + $0x68] sm:$0xff] %v564_v47 }
 0x12c PF: > { %p1088_p12 = scmp.le.s32.totalorder %s1428_s20, 0 }
 0x12d   : > { %v600_v48 = vld [vmem:[#allocation2] sm:$0xff] (!%p1088_p12)  ;;  %v601_v49 = vld [vmem:[#allocation2 + $0x8] sm:$0xff] (!%p1088_p12)  ;;  %v602_v50 = vld [vmem:[#allocation2 + $0x10] sm:$0xff] (!%p1088_p12) }
 0x12e   : > { %599 = sbr.rel (%p1088_p12) target bundleno = 313 (0x139), region = 89  ;;  %v616_v51 = vadd.f32 (!%p1088_p12), %v600_v48, %v513_v34  ;;  %v617_v52 = vadd.f32 (!%p1088_p12), %v601_v49, %v516_v38  ;;  %v618_v53 = vadd.f32 (!%p1088_p12), %v1231_v32, %v602_v50  ;;  %v603_v54 = vld [vmem:[#allocation2 + $0x18] sm:$0xff] (!%p1088_p12)  ;;  %v608_v62 = vld [vmem:[#allocation2 + $0x40] sm:$0xff] (!%p1088_p12)  ;;  %v609_v2 = vld [vmem:[#allocation2 + $0x48] sm:$0xff] (!%p1088_p12) }
 0x12f   : > { %v619_v57 = vadd.f32 (!%p1088_p12), %v1232_v36, %v603_v54  ;;  %v624_v1 = vadd.f32 (!%p1088_p12), %v608_v62, %v545_v35  ;;  %v610_v3 = vld [vmem:[#allocation2 + $0x50] sm:$0xff] (!%p1088_p12)  ;;  %v611_v4 = vld [vmem:[#allocation2 + $0x58] sm:$0xff] (!%p1088_p12)  ;;  %v625_v5 = vadd.f32 (!%p1088_p12), %v609_v2, %v548_v39 }
 0x130   : > { %v606_v60 = vld [vmem:[#allocation2 + $0x30] sm:$0xff] (!%p1088_p12)  ;;  %632 = vst [vmem:[#allocation2] sm:$0xff] (!%p1088_p12), %v616_v51  ;;  %633 = vst [vmem:[#allocation2 + $0x8] sm:$0xff] (!%p1088_p12), %v617_v52  ;;  %v626_v6 = vadd.f32 (!%p1088_p12), %v1587_v33, %v610_v3  ;;  %v627_v7 = vadd.f32 (!%p1088_p12), %v1240_v37, %v611_v4 }
 0x131   : > { %v604_v55 = vld [vmem:[#allocation2 + $0x20] sm:$0xff] (!%p1088_p12)  ;;  %634 = vst [vmem:[#allocation2 + $0x10] sm:$0xff] (!%p1088_p12), %v618_v53  ;;  %v622_v63 = vadd.f32 (!%p1088_p12), %v1235_v40, %v606_v60  ;;  %635 = vst [vmem:[#allocation2 + $0x18] sm:$0xff] (!%p1088_p12), %v619_v57  ;;  %v614_v10 = vld [vmem:[#allocation2 + $0x70] sm:$0xff] (!%p1088_p12) }
 0x132   : > { %v605_v56 = vld [vmem:[#allocation2 + $0x28] sm:$0xff] (!%p1088_p12)  ;;  %v620_v58 = vadd.f32 (!%p1088_p12), %v604_v55, %v529_v42  ;;  %v607_v61 = vld [vmem:[#allocation2 + $0x38] sm:$0xff] (!%p1088_p12)  ;;  %v612_v8 = vld [vmem:[#allocation2 + $0x60] sm:$0xff] (!%p1088_p12)  ;;  %640 = vst [vmem:[#allocation2 + $0x40] sm:$0xff] (!%p1088_p12), %v624_v1  ;;  %v630_v13 = vadd.f32 (!%p1088_p12), %v1589_v41, %v614_v10 }
 0x133   : > { %v621_v59 = vadd.f32 (!%p1088_p12), %v605_v56, %v532_v46  ;;  %v623_v0 = vadd.f32 (!%p1088_p12), %v1236_v44, %v607_v61  ;;  %v613_v9 = vld [vmem:[#allocation2 + $0x68] sm:$0xff] (!%p1088_p12)  ;;  %638 = vst [vmem:[#allocation2 + $0x30] sm:$0xff] (!%p1088_p12), %v622_v63  ;;  %v628_v11 = vadd.f32 (!%p1088_p12), %v612_v8, %v561_v43  ;;  %v615_v14 = vld [vmem:[#allocation2 + $0x78] sm:$0xff] (!%p1088_p12)  ;;  %641 = vst [vmem:[#allocation2 + $0x48] sm:$0xff] (!%p1088_p12), %v625_v5 }
 0x134   : > { %636 = vst [vmem:[#allocation2 + $0x20] sm:$0xff] (!%p1088_p12), %v620_v58  ;;  %v629_v12 = vadd.f32 (!%p1088_p12), %v613_v9, %v564_v47  ;;  %642 = vst [vmem:[#allocation2 + $0x50] sm:$0xff] (!%p1088_p12), %v626_v6  ;;  %v631_v15 = vadd.f32 (!%p1088_p12), %v1591_v45, %v615_v14 }
 0x135   : > { %637 = vst [vmem:[#allocation2 + $0x28] sm:$0xff] %v621_v59  ;;  %639 = vst [vmem:[#allocation2 + $0x38] sm:$0xff] %v623_v0 }
 0x136   : > { %643 = vst [vmem:[#allocation2 + $0x58] sm:$0xff] %v627_v7  ;;  %644 = vst [vmem:[#allocation2 + $0x60] sm:$0xff] %v628_v11 }
 0x137   : > { %645 = vst [vmem:[#allocation2 + $0x68] sm:$0xff] %v629_v12  ;;  %646 = vst [vmem:[#allocation2 + $0x70] sm:$0xff] %v630_v13 }
 0x138   : > { %647 = vst [vmem:[#allocation2 + $0x78] sm:$0xff] %v631_v15 }
 0x139 PF: > { %p1089_p13 = scmp.ne.s32.totalorder %s1428_s20, 2 }
 0x13a   : > { %v1382_v16 = vld [vmem:[%s1681_s2] sm:$0xff] (!%p1089_p13)   ;;  %v1383_v17 = vld [vmem:[%s1681_s2 + $0x8] sm:$0xff] (!%p1089_p13)   ;;  %v1384_v18 = vld [vmem:[%s1681_s2 + $0x10] sm:$0xff] (!%p1089_p13)  }
 0x13b   : > { %651 = sbr.rel (%p1089_p13) target bundleno = 580 (0x244), region = 93  ;;  %1245 = vmatprep.subr.bf16.mxu0 (!%p1089_p13), %v1382_v16  ;;  %1293 = vmatprep.subr.bf16.mxu1 (!%p1089_p13), %v1382_v16  ;;  %v1385_v19 = vld [vmem:[%s1681_s2 + $0x18] sm:$0xff] (!%p1089_p13)   ;;  %v652_v20 = vld [vmem:[#allocation2] sm:$0xff] (!%p1089_p13)  ;;  %v653_v21 = vld [vmem:[#allocation2 + $0x8] sm:$0xff] (!%p1089_p13) }
 0x13c   : > { %1246 = vmatpush3.bf16.msra.mxu0 (!%p1089_p13), %v1382_v16  ;;  %1301 = vmatpush3.bf16.msra.mxu1 (!%p1089_p13), %v1382_v16  ;;  %v668_v23 = vpack.c.bf16 (!%p1089_p13), %v653_v21, %v652_v20  ;;  %v1386_v26 = vld [vmem:[%s1681_s2 + $0x20] sm:$0xff] (!%p1089_p13)   ;;  %v1387_v27 = vld [vmem:[%s1681_s2 + $0x28] sm:$0xff] (!%p1089_p13)   ;;  %v1388_v28 = vld [vmem:[%s1681_s2 + $0x30] sm:$0xff] (!%p1089_p13)  }
 0x13d   : > { %1247 = vmatprep.subr.bf16.mxu0 (!%p1089_p13), %v1383_v17  ;;  %1294 = vmatprep.subr.bf16.mxu1 (!%p1089_p13), %v1383_v17  ;;  %v660_v22 = vld [vmem:[#allocation2 + $0x40] sm:$0xff] (!%p1089_p13)  ;;  %v1389_v29 = vld [vmem:[%s1681_s2 + $0x38] sm:$0xff] (!%p1089_p13)   ;;  %v654_v30 = vld [vmem:[#allocation2 + $0x10] sm:$0xff] (!%p1089_p13) }
 0x13e   : > { %v661_v24 = vld [vmem:[#allocation2 + $0x48] sm:$0xff] (!%p1089_p13)  ;;  %1261 = vmatprep.mubr.bf16.mxu0 (!%p1089_p13), %v668_v23  ;;  %v655_v31 = vld [vmem:[#allocation2 + $0x18] sm:$0xff] (!%p1089_p13)  ;;  %v664_v36 = vld [vmem:[#allocation2 + $0x60] sm:$0xff] (!%p1089_p13) }
 0x13f   : > { %v672_v25 = vpack.c.bf16 (!%p1089_p13), %v661_v24, %v660_v22  ;;  %v662_v32 = vld [vmem:[#allocation2 + $0x50] sm:$0xff] (!%p1089_p13)  ;;  %v663_v33 = vld [vmem:[#allocation2 + $0x58] sm:$0xff] (!%p1089_p13)  ;;  %v656_v34 = vld [vmem:[#allocation2 + $0x20] sm:$0xff] (!%p1089_p13)  ;;  %v669_v38 = vpack.c.bf16 (!%p1089_p13), %v655_v31, %v654_v30 }
 0x140   : > { %1248 = vmatpush3.bf16.msra.mxu0 (!%p1089_p13), %v1383_v17  ;;  %1302 = vmatpush3.bf16.msra.mxu1 (!%p1089_p13), %v1383_v17  ;;  %v657_v35 = vld [vmem:[#allocation2 + $0x28] sm:$0xff] (!%p1089_p13)  ;;  %v673_v39 = vpack.c.bf16 (!%p1089_p13), %v663_v33, %v662_v32  ;;  %v658_v42 = vld [vmem:[#allocation2 + $0x30] sm:$0xff] (!%p1089_p13)  ;;  %v659_v43 = vld [vmem:[#allocation2 + $0x38] sm:$0xff] (!%p1089_p13) }
 0x141   : > { %1249 = vmatprep.subr.bf16.mxu0 (!%p1089_p13), %v1384_v18  ;;  %1295 = vmatprep.subr.bf16.mxu1 (!%p1089_p13), %v1384_v18  ;;  %v665_v37 = vld [vmem:[#allocation2 + $0x68] sm:$0xff] (!%p1089_p13)  ;;  %v670_v40 = vpack.c.bf16 (!%p1089_p13), %v657_v35, %v656_v34  ;;  %v666_v44 = vld [vmem:[#allocation2 + $0x70] sm:$0xff] (!%p1089_p13)  ;;  %v667_v45 = vld [vmem:[#allocation2 + $0x78] sm:$0xff] (!%p1089_p13)  ;;  %v671_v46 = vpack.c.bf16 (!%p1089_p13), %v659_v43, %v658_v42 }
 0x142   : > { %1269 = vmatprep.mubr.bf16.mxu1 %v672_v25  ;;  %v674_v41 = vpack.c.bf16 %v665_v37, %v664_v36  ;;  %v675_v47 = vpack.c.bf16 %v667_v45, %v666_v44  ;;  %v1098_v48 = vld [vmem:[%s1682_s3] ss:$0 sm:$0xff] }
 0x143   : > { %v1632_v50 = vld [vmem:[%s1683_s4] ss:$0 sm:$0xff] }
 0x144   : > { %1250 = vmatpush3.bf16.msra.mxu0 %v1384_v18  ;;  %1303 = vmatpush3.bf16.msra.mxu1 %v1384_v18 }
 0x145   : > { %1251 = vmatprep.subr.bf16.mxu0 %v1385_v19  ;;  %1296 = vmatprep.subr.bf16.mxu1 %v1385_v19 }
 0x148   : > { %1252 = vmatpush3.bf16.msra.mxu0 %v1385_v19  ;;  %1304 = vmatpush3.bf16.msra.mxu1 %v1385_v19 }
 0x149   : > { %1253 = vmatprep.subr.bf16.mxu0 %v1386_v26  ;;  %1297 = vmatprep.subr.bf16.mxu1 %v1386_v26 }
 0x14c   : > { %1254 = vmatpush3.bf16.msra.mxu0 %v1386_v26  ;;  %1305 = vmatpush3.bf16.msra.mxu1 %v1386_v26 }
 0x14d   : > { %1255 = vmatprep.subr.bf16.mxu0 %v1387_v27  ;;  %1298 = vmatprep.subr.bf16.mxu1 %v1387_v27 }
 0x150   : > { %1256 = vmatpush3.bf16.msra.mxu0 %v1387_v27  ;;  %1306 = vmatpush3.bf16.msra.mxu1 %v1387_v27 }
 0x151   : > { %1257 = vmatprep.subr.bf16.mxu0 %v1388_v28  ;;  %1299 = vmatprep.subr.bf16.mxu1 %v1388_v28 }
 0x154   : > { %1258 = vmatpush3.bf16.msra.mxu0 %v1388_v28  ;;  %1307 = vmatpush3.bf16.msra.mxu1 %v1388_v28 }
 0x155   : > { %1259 = vmatprep.subr.bf16.mxu0 %v1389_v29  ;;  %1300 = vmatprep.subr.bf16.mxu1 %v1389_v29 }
 0x158   : > { %1260 = vmatpush3.bf16.msra.mxu0 %v1389_v29  ;;  %1308 = vmatpush3.bf16.msra.mxu1 %v1389_v29 }
 0x15b   : > { %1262 = vmatmul.mubr.bf16.vlgmr.msra.gmra.mrb[0].mxu0 %v669_v38  ;;  %1270 = vmatmul.mubr.bf16.vlgmr.msra.gmra.mrb[0].mxu1 %v673_v39 }
 0x15c   : > { %1265 = vmatprep.mubr.bf16.mxu0 %v670_v40  ;;  %1273 = vmatprep.mubr.bf16.mxu1 %v674_v41 }
 0x163   : > { %1266 = vmatmul.mubr.bf16.gmra.mrb[4].mxu0 %v671_v46  ;;  %1274 = vmatmul.mubr.bf16.gmra.mrb[4].mxu1 %v675_v47 }
 0x22e   : > { %v1263_v49 = vpop.f32.mrb[0].mxu0  ;;  %v1271_v51 = vpop.f32.mrb[0].mxu1 }
 0x22f   : > { %v846_v52 = vmul.f32 %v1263_v49, %v1098_v48  ;;  %v854_v53 = vmul.f32 %v1271_v51, %v1098_v48  ;;  %v774_v54 = vpop.f32.mrb[1].mxu0  ;;  %v806_v55 = vpop.f32.mrb[1].mxu1 }
 0x230   : > { %v844_v56 = vmul.f32 %v1098_v48, %v774_v54  ;;  %v852_v57 = vmul.f32 %v1098_v48, %v806_v55  ;;  %v1264_v58 = vpop.f32.mrb[2].mxu0  ;;  %v1272_v59 = vpop.f32.mrb[2].mxu1 }
 0x231   : > { %v869_v60 = vadd.f32 %v1632_v50, %v846_v52  ;;  %v877_v61 = vadd.f32 %v1632_v50, %v854_v53  ;;  %v847_v62 = vmul.f32 %v1264_v58, %v1098_v48  ;;  %v855_v63 = vmul.f32 %v1272_v59, %v1098_v48  ;;  %v777_v0 = vpop.f32.mrb[3].mxu0  ;;  %v809_v1 = vpop.f32.mrb[3].mxu1 }
 0x232   : > { %v867_v2 = vadd.f32 %v1632_v50, %v844_v56  ;;  %v875_v3 = vadd.f32 %v1632_v50, %v852_v57  ;;  %v845_v4 = vmul.f32 %v1098_v48, %v777_v0  ;;  %v853_v5 = vmul.f32 %v1098_v48, %v809_v1 }
 0x233   : > { %v870_v6 = vadd.f32 %v1632_v50, %v847_v62  ;;  %v878_v7 = vadd.f32 %v1632_v50, %v855_v63  ;;  %v885_v10 = vmax.f32 %v869_v60, 0.0  ;;  %v893_v11 = vmax.f32 %v877_v61, 0.0 }
 0x234   : > { %v868_v8 = vadd.f32 %v1632_v50, %v845_v4  ;;  %v876_v9 = vadd.f32 %v1632_v50, %v853_v5  ;;  %v883_v14 = vmax.f32 %v867_v2, 0.0  ;;  %v891_v15 = vmax.f32 %v875_v3, 0.0 }
 0x235   : > { %v886_v12 = vmax.f32 %v870_v6, 0.0  ;;  %v894_v13 = vmax.f32 %v878_v7, 0.0 }
 0x236   : > { %v884_v16 = vmax.f32 %v868_v8, 0.0  ;;  %v892_v17 = vmax.f32 %v876_v9, 0.0  ;;  %v1267_v18 = vpop.f32.mrb[4].mxu0  ;;  %v1275_v19 = vpop.f32.mrb[4].mxu1 }
 0x237   : > { %v1142_v20 = vpack.c.bf16 %v886_v12, %v885_v10  ;;  %v1162_v21 = vpack.c.bf16 %v894_v13, %v893_v11  ;;  %v850_v22 = vmul.f32 %v1267_v18, %v1098_v48  ;;  %v858_v23 = vmul.f32 %v1275_v19, %v1098_v48  ;;  %v790_v24 = vpop.f32.mrb[5].mxu0  ;;  %v822_v25 = vpop.f32.mrb[5].mxu1 }
 0x238   : > { %v1137_v26 = vpack.c.bf16 %v884_v16, %v883_v14  ;;  %v1157_v27 = vpack.c.bf16 %v892_v17, %v891_v15  ;;  %v848_v28 = vmul.f32 %v1098_v48, %v790_v24  ;;  %v856_v29 = vmul.f32 %v1098_v48, %v822_v25  ;;  %v1268_v30 = vpop.f32.mrb[6].mxu0  ;;  %v1276_v31 = vpop.f32.mrb[6].mxu1 }
 0x239   : > { %1174 = vst [vmem:[%s1568_s21 + $0x8] sm:$0xff] %v1142_v20   ;;  %1178 = vst [vmem:[%s1568_s21 + $0x28] sm:$0xff] %v1162_v21   ;;  %v873_v32 = vadd.f32 %v1632_v50, %v850_v22  ;;  %v881_v33 = vadd.f32 %v1632_v50, %v858_v23  ;;  %v851_v34 = vmul.f32 %v1268_v30, %v1098_v48  ;;  %v793_v36 = vpop.f32.mrb[7].mxu0  ;;  %v825_v37 = vpop.f32.mrb[7].mxu1 }
 0x23a   : > { %v859_v35 = vmul.f32 %v1276_v31, %v1098_v48  ;;  %1138 = vst [vmem:[%s1568_s21] sm:$0xff] %v1137_v26   ;;  %1177 = vst [vmem:[%s1568_s21 + $0x20] sm:$0xff] %v1157_v27   ;;  %v871_v38 = vadd.f32 %v1632_v50, %v848_v28  ;;  %v879_v39 = vadd.f32 %v1632_v50, %v856_v29 }
 0x23b   : > { %v849_v40 = vmul.f32 %v1098_v48, %v793_v36  ;;  %v857_v41 = vmul.f32 %v1098_v48, %v825_v37  ;;  %v874_v42 = vadd.f32 %v1632_v50, %v851_v34  ;;  %v889_v46 = vmax.f32 %v873_v32, 0.0 }
 0x23c   : > { %v882_v43 = vadd.f32 %v1632_v50, %v859_v35  ;;  %v897_v47 = vmax.f32 %v881_v33, 0.0  ;;  %v887_v52 = vmax.f32 %v871_v38, 0.0  ;;  %v895_v53 = vmax.f32 %v879_v39, 0.0 }
 0x23d   : > { %v872_v44 = vadd.f32 %v1632_v50, %v849_v40  ;;  %v880_v45 = vadd.f32 %v1632_v50, %v857_v41  ;;  %v890_v49 = vmax.f32 %v874_v42, 0.0 }
 0x23e   : > { %v898_v51 = vmax.f32 %v882_v43, 0.0 }
 0x23f   : > { %v888_v54 = vmax.f32 %v872_v44, 0.0  ;;  %v896_v48 = vmax.f32 %v880_v45, 0.0  ;;  %v1152_v55 = vpack.c.bf16 %v890_v49, %v889_v46 }
 0x240   : > { %v1172_v56 = vpack.c.bf16 %v898_v51, %v897_v47 }
 0x241   : > { %v1147_v57 = vpack.c.bf16 %v888_v54, %v887_v52  ;;  %v1167_v58 = vpack.c.bf16 %v896_v48, %v895_v53  ;;  %1176 = vst [vmem:[%s1568_s21 + $0x18] sm:$0xff] %v1152_v55  }
 0x242   : > { %1180 = vst [vmem:[%s1568_s21 + $0x38] sm:$0xff] %v1172_v56  }
 0x243   : > { %1175 = vst [vmem:[%s1568_s21 + $0x10] sm:$0xff] %v1147_v57   ;;  %1179 = vst [vmem:[%s1568_s21 + $0x30] sm:$0xff] %v1167_v58  }
 0x244 PF: > { %s15_s24 = sadd.s32 1, %s1444_s24   ;;  %s1685_s18 = smov %s1424_s19 }
 0x245   : > { %p12_p0 = scmp.ge.s32.totalorder %s15_s24, 11   ;;  %s1686_s19 = smov %s1527_s6 }
 0x246   : > { %s1687_s20 = smov %s1436_s22  ;;  %s1688_s21 = smov %s1440_s23 }
 0x247   : > { %s1689_s22 = smov %s1692_s25  ;;  %s1690_s23 = smov %s1696_s26 }
 0x248   :  { %14 = sbr.rel (!%p12_p0) target bundleno = 4 (0x4), region = 129 }

</bundles_post_ra>
